<compile_context>
chip_gen: v7x
topology: tpu7x:2x2x1
jax: 0.10.0
libtpu: 0.0.40
codegen_flags: <defaults>
</compile_context>

<pallas_src>
import jax
import jax.numpy as jnp
from jax import lax
from jax.experimental import pallas as pl
from jax.experimental.pallas import tpu as pltpu

B, S, H = 2, 8, 32
BS = B * S
NUM_HEADS = 2
HEAD_DIM = H // NUM_HEADS
FFN = 64
VOCAB = 100
NUM_LABELS = 5
NUM_LAYERS = 2
LN_EPS = 1e-12
LANES = 128          # lane-dense width: padded vocab, logits slab, packed vectors
NEG_INF = -1e9


def _layer_norm(v, g, b, eps=LN_EPS):
    # single-pass form: two independent cross-lane reductions (XLU can pipeline them)
    mu = jnp.mean(v, axis=-1, keepdims=True)
    msq = jnp.mean(v * v, axis=-1, keepdims=True)
    var = jnp.maximum(msq - mu * mu, 0.0)
    return (v - mu) * lax.rsqrt(var + eps) * g + b


# ------------------------------ fused Pallas kernel ------------------------------ #
def fused_forward_kernel(ids_ref, labels_ref, mask_ref,
                         we_ref, pe_ref, gvec_ref, lvec_ref,
                         win_ref, w2_ref, wc_ref,
                         logits_ref, loss_ref):
    f32 = jnp.float32
    bf16 = jnp.bfloat16

    gv = gvec_ref[...]                                            # (3, 128) f32
    elng = gv[0, :H]
    elnb = gv[1, :H]
    bc = gv[2, :]                                                 # classifier bias, -1e9 pad

    # ---- embeddings: token gather as a lane-aligned one-hot MXU matmul (K=128) ----
    ids = ids_ref[...]                                            # (BS, 1) int32
    vocab_iota = lax.broadcasted_iota(jnp.int32, (BS, LANES), 1)
    onehot_ids = (ids == vocab_iota).astype(bf16)                 # (BS, 128) bf16
    emb = jnp.dot(onehot_ids, we_ref[...], preferred_element_type=f32)   # (BS, H)
    x = emb.reshape(B, S, H) + pe_ref[...][None, :, :]
    x = _layer_norm(x.reshape(BS, H), elng, elnb)                 # (BS, H) f32

    # ---- additive key mask, replicated once per head along the B*NH batch dim ----
    bias = (1.0 - mask_ref[...])[:, None, :] * NEG_INF            # (B, 1, S)
    bias_bh = jnp.concatenate([bias] * NUM_HEADS, axis=0)         # (B*NH, 1, S)

    scale = 1.0 / (HEAD_DIM ** 0.5)
    for l in range(NUM_LAYERS):                                   # weights stay VMEM-resident
        lv = lvec_ref[l]                                          # (8, 128) f32
        win = win_ref[l]                                          # (H, 192) bf16: [wqkv|wo|w1]
        wqkv = win[:, :3 * H]
        wo = win[:, 3 * H:4 * H]
        w1 = win[:, 4 * H:4 * H + FFN]
        bqkv = lv[0, :3 * H]
        bo = lv[1, :H]
        ln1g, ln1b = lv[2, :H], lv[3, :H]
        b1 = lv[4, :FFN]
        b2 = lv[5, :H]
        ln2g, ln2b = lv[6, :H], lv[7, :H]

        xb = x.astype(bf16)
        qkv = jnp.dot(xb, wqkv, preferred_element_type=f32) + bqkv   # (BS, 96)
        qkv3 = qkv.reshape(B, S, 3 * H)

        def heads(lo, qkv3=qkv3):
            # stack heads along the leading dim -> (B*NH, S, HEAD_DIM), head-major
            return jnp.concatenate(
                [qkv3[:, :, lo + h * HEAD_DIM: lo + (h + 1) * HEAD_DIM]
                 for h in range(NUM_HEADS)], axis=0).astype(bf16)

        q_bh, k_bh, v_bh = heads(0), heads(H), heads(2 * H)

        # single batched attention over B*NUM_HEADS (one score einsum + one softmax)
        s = jnp.einsum('bqd,bkd->bqk', q_bh, k_bh, preferred_element_type=f32)
        s = s * scale + bias_bh
        s = s - jnp.max(s, axis=-1, keepdims=True)
        p = jnp.exp(s)
        p = p * pl.reciprocal(jnp.sum(p, axis=-1, keepdims=True), approx=True)
        ctx_bh = jnp.einsum('bqk,bkd->bqd', p.astype(bf16), v_bh,
                            preferred_element_type=f32)              # (B*NH, S, HD)
        ctx = jnp.concatenate(
            [ctx_bh[h * B:(h + 1) * B] for h in range(NUM_HEADS)],
            axis=-1).reshape(BS, H)                                   # re-interleave heads

        attn = jnp.dot(ctx.astype(bf16), wo, preferred_element_type=f32) + bo
        h1 = _layer_norm(x + attn, ln1g, ln1b)

        f = jnp.dot(h1.astype(bf16), w1, preferred_element_type=f32) + b1
        # TODO(synk): HF BERT uses exact erf GELU; tanh approximation kept (erf lowering
        # on Mosaic is not guaranteed).
        f = jax.nn.gelu(f, approximate=True)
        f = jnp.dot(f.astype(bf16), w2_ref[l], preferred_element_type=f32) + b2
        x = _layer_norm(h1 + f, ln2g, ln2b)

    # ---- classifier: lane-dense (BS, 128) slab (padded cols have bias -1e9) ----
    logits = jnp.dot(x.astype(bf16), wc_ref[...], preferred_element_type=f32) + bc
    logits_ref[...] = logits                                       # unmasked lane-dense store

    # ---- per-token cross-entropy, reduced in-kernel to a scalar (SMEM output) ----
    z = logits - jnp.max(logits, axis=-1, keepdims=True)           # padded cols -> exp == 0
    logp = z - jnp.log(jnp.sum(jnp.exp(z), axis=-1, keepdims=True))
    lab = labels_ref[...]                                          # (BS, 1) int32
    valid = (lab >= 0).astype(f32)                                 # ignore_index = -100
    lab_c = jnp.where(lab >= 0, lab, 0)
    onehot_lab = (lab_c == lax.broadcasted_iota(jnp.int32, (BS, LANES), 1)).astype(f32)
    nll = -jnp.sum(onehot_lab * logp, axis=-1, keepdims=True) * valid
    loss_ref[0, 0] = jnp.sum(nll) / jnp.maximum(jnp.sum(valid), 1.0)


# ------------------------------ pallas_call wrapper ------------------------------ #
def fused_forward(*args):
    vmem = lambda: pl.BlockSpec(memory_space=pltpu.MemorySpace.VMEM)
    return pl.pallas_call(
        fused_forward_kernel,
        in_specs=[vmem() for _ in args],
        out_specs=(
            vmem(),
            pl.BlockSpec(memory_space=pltpu.MemorySpace.SMEM),
        ),
        out_shape=(
            jax.ShapeDtypeStruct((BS, LANES), jnp.float32),
            jax.ShapeDtypeStruct((1, 1), jnp.float32),
        ),
    )(*args)


# ------------------------------- params & packing -------------------------------- #
def init_params(key):
    keys = iter(jax.random.split(key, 64))
    dense = lambda shape: 0.02 * jax.random.normal(next(keys), shape, jnp.float32)
    zeros = lambda shape: jnp.zeros(shape, jnp.float32)
    ones = lambda shape: jnp.ones(shape, jnp.float32)
    params = {
        "word_emb": dense((VOCAB, H)),
        "pos_emb": dense((S, H)),
        "emb_ln_g": ones((1, H)),
        "emb_ln_b": zeros((1, H)),
        "layers": [],
        "wc": dense((H, NUM_LABELS)),
        "bc": zeros((1, NUM_LABELS)),
    }
    for _ in range(NUM_LAYERS):
        params["layers"].append({
            "wq": dense((H, H)), "bq": zeros((1, H)),
            "wk": dense((H, H)), "bk": zeros((1, H)),
            "wv": dense((H, H)), "bv": zeros((1, H)),
            "wo": dense((H, H)), "bo": zeros((1, H)),
            "ln1g": ones((1, H)), "ln1b": zeros((1, H)),
            "w1": dense((H, FFN)), "b1": zeros((1, FFN)),
            "w2": dense((FFN, H)), "b2": zeros((1, H)),
            "ln2g": ones((1, H)), "ln2b": zeros((1, H)),
        })
    return params


def pack_weights(params):
    """Collapse ~25 small operands into 7 packed, lane-aligned arrays."""
    bf16 = jnp.bfloat16
    L = NUM_LAYERS

    # vocab padded to 128 rows (lane-aligned one-hot gather / K=128 contraction)
    we_pad = jnp.zeros((LANES, H), jnp.float32).at[:VOCAB].set(params["word_emb"]).astype(bf16)
    pe = params["pos_emb"]

    # global vectors: emb-LN gamma/beta + padded classifier bias (-1e9 on padded cols)
    gvec = jnp.zeros((3, LANES), jnp.float32)
    gvec = gvec.at[0, :H].set(params["emb_ln_g"][0])
    gvec = gvec.at[1, :H].set(params["emb_ln_b"][0])
    bc_pad = jnp.full((LANES,), NEG_INF, jnp.float32).at[:NUM_LABELS].set(params["bc"][0])
    gvec = gvec.at[2].set(bc_pad)

    # per-layer small vectors -> one (L, 8, 128) f32 slab
    lvec = jnp.zeros((L, 8, LANES), jnp.float32)
    # per-layer H-input matrices [wqkv | wo | w1] -> one (L, H, 192) bf16 slab; w2 stacked
    w_in = jnp.zeros((L, H, 3 * H + H + FFN), jnp.float32)
    w2 = jnp.zeros((L, FFN, H), jnp.float32)
    for l, lp in enumerate(params["layers"]):
        bqkv = jnp.concatenate([lp["bq"][0], lp["bk"][0], lp["bv"][0]])      # (96,)
        lvec = lvec.at[l, 0, :3 * H].set(bqkv)
        lvec = lvec.at[l, 1, :H].set(lp["bo"][0])
        lvec = lvec.at[l, 2, :H].set(lp["ln1g"][0])
        lvec = lvec.at[l, 3, :H].set(lp["ln1b"][0])
        lvec = lvec.at[l, 4, :FFN].set(lp["b1"][0])
        lvec = lvec.at[l, 5, :H].set(lp["b2"][0])
        lvec = lvec.at[l, 6, :H].set(lp["ln2g"][0])
        lvec = lvec.at[l, 7, :H].set(lp["ln2b"][0])
        wqkv = jnp.concatenate([lp["wq"], lp["wk"], lp["wv"]], axis=1)       # (H, 96)
        w_in = w_in.at[l].set(jnp.concatenate([wqkv, lp["wo"], lp["w1"]], axis=1))
        w2 = w2.at[l].set(lp["w2"])

    # lane-dense padded classifier weights (zero weight on padded columns)
    wc_pad = jnp.zeros((H, LANES), jnp.float32).at[:, :NUM_LABELS].set(params["wc"]).astype(bf16)

    return [we_pad, pe, gvec, lvec, w_in.astype(bf16), w2.astype(bf16), wc_pad]


def forward(params, input_ids, attention_mask, labels):
    weights = pack_weights(params)
    ids = input_ids.reshape(BS, 1).astype(jnp.int32)
    labs = labels.reshape(BS, 1).astype(jnp.int32)
    mask_f = attention_mask.astype(jnp.float32)                    # (B, S)

    logits_pad, loss = fused_forward(ids, labs, mask_f, *weights)
    logits = logits_pad[:, :NUM_LABELS].reshape(B, S, NUM_LABELS)
    return loss[0, 0], logits                                      # ~ (outputs.loss, outputs.logits)


if __name__ == "__main__":
    key = jax.random.PRNGKey(0)
    k_params, k_ids, k_labels = jax.random.split(key, 3)
    params = init_params(k_params)

    input_ids = jax.random.randint(k_ids, (B, S), 0, VOCAB, dtype=jnp.int32)
    attention_mask = jnp.ones((B, S), jnp.int32).at[:, 6:].set(0)  # last 2 tokens padded
    labels = jax.random.randint(k_labels, (B, S), 0, NUM_LABELS, dtype=jnp.int32)
    labels = jnp.where(attention_mask == 1, labels, -100)

    loss, logits = forward(params, input_ids, attention_mask, labels)
    jax.block_until_ready((loss, logits))
    print("KERNEL_OK")
</pallas_src>

<mosaic_0001>
module attributes {stable_mosaic.version = 11 : i64} {
  func.func @fused_forward_kernel(%arg0: memref<16x1xi32, #tpu.memory_space<vmem>>, %arg1: memref<16x1xi32, #tpu.memory_space<vmem>>, %arg2: memref<2x8xf32, #tpu.memory_space<vmem>>, %arg3: memref<128x32xbf16, #tpu.memory_space<vmem>>, %arg4: memref<8x32xf32, #tpu.memory_space<vmem>>, %arg5: memref<3x128xf32, #tpu.memory_space<vmem>>, %arg6: memref<2x8x128xf32, #tpu.memory_space<vmem>>, %arg7: memref<2x32x192xbf16, #tpu.memory_space<vmem>>, %arg8: memref<2x64x32xbf16, #tpu.memory_space<vmem>>, %arg9: memref<32x128xbf16, #tpu.memory_space<vmem>>, %arg10: memref<16x128xf32, #tpu.memory_space<vmem>>, %arg11: memref<1x1xf32, #tpu.memory_space<smem>>) attributes {dimension_semantics = [], scalar_prefetch = 0 : i64, scratch_operands = 0 : i64, tpu.core_type = #tpu.core_type<tc>} {
    %c0 = arith.constant 0 : index
    %c0_0 = arith.constant 0 : index
    %0 = vector.load %arg5[%c0, %c0_0] : memref<3x128xf32, #tpu.memory_space<vmem>>, vector<3x128xf32>
    %1 = vector.extract_strided_slice %0 {offsets = [0, 0], sizes = [1, 32], strides = [1, 1]} : vector<3x128xf32> to vector<1x32xf32>
    %2 = vector.shape_cast %1 : vector<1x32xf32> to vector<32xf32>
    %3 = vector.extract_strided_slice %0 {offsets = [1, 0], sizes = [1, 32], strides = [1, 1]} : vector<3x128xf32> to vector<1x32xf32>
    %4 = vector.shape_cast %3 : vector<1x32xf32> to vector<32xf32>
    %5 = vector.extract_strided_slice %0 {offsets = [2, 0], sizes = [1, 128], strides = [1, 1]} : vector<3x128xf32> to vector<1x128xf32>
    %6 = vector.shape_cast %5 : vector<1x128xf32> to vector<128xf32>
    %c0_1 = arith.constant 0 : index
    %c0_2 = arith.constant 0 : index
    %7 = vector.load %arg0[%c0_1, %c0_2] : memref<16x1xi32, #tpu.memory_space<vmem>>, vector<16x1xi32>
    %8 = tpu.iota {dimensions = array<i32: 1>} : vector<16x128xi32>
    %9 = vector.broadcast %7 : vector<16x1xi32> to vector<16x128xi32>
    %10 = arith.cmpi eq, %9, %8 : vector<16x128xi32>
    %11 = arith.extui %10 : vector<16x128xi1> to vector<16x128xi32>
    %12 = arith.sitofp %11 : vector<16x128xi32> to vector<16x128xf32>
    %13 = arith.truncf %12 : vector<16x128xf32> to vector<16x128xbf16>
    %c0_3 = arith.constant 0 : index
    %c0_4 = arith.constant 0 : index
    %14 = vector.load %arg3[%c0_3, %c0_4] : memref<128x32xbf16, #tpu.memory_space<vmem>>, vector<128x32xbf16>
    %cst = arith.constant dense<0.000000e+00> : vector<16x32xf32>
    %15 = tpu.matmul %13, %14, %cst {dimension_numbers = #tpu.dot_dimension_numbers<[1], [0], [0], [1], [0, 0, 1, 1], [], []>} : vector<16x128xbf16>, vector<128x32xbf16>, vector<16x32xf32> -> vector<16x32xf32>
    %16 = vector.shape_cast %15 : vector<16x32xf32> to vector<2x8x32xf32>
    %c0_5 = arith.constant 0 : index
    %c0_6 = arith.constant 0 : index
    %17 = vector.load %arg4[%c0_5, %c0_6] : memref<8x32xf32, #tpu.memory_space<vmem>>, vector<8x32xf32>
    %18 = vector.shape_cast %17 : vector<8x32xf32> to vector<1x8x32xf32>
    %19 = vector.broadcast %18 : vector<1x8x32xf32> to vector<2x8x32xf32>
    %20 = arith.addf %16, %19 : vector<2x8x32xf32>
    %21 = vector.shape_cast %20 : vector<2x8x32xf32> to vector<16x32xf32>
    %cst_7 = arith.constant dense<0.000000e+00> : vector<16xf32>
    %22 = vector.multi_reduction <add>, %21, %cst_7 [1] : vector<16x32xf32> to vector<16xf32>
    %23 = vector.shape_cast %22 : vector<16xf32> to vector<16x1xf32>
    %cst_8 = arith.constant 3.200000e+01 : f32
    %24 = vector.broadcast %cst_8 : f32 to vector<16x1xf32>
    %25 = arith.divf %23, %24 : vector<16x1xf32>
    %26 = arith.mulf %21, %21 : vector<16x32xf32>
    %cst_9 = arith.constant dense<0.000000e+00> : vector<16xf32>
    %27 = vector.multi_reduction <add>, %26, %cst_9 [1] : vector<16x32xf32> to vector<16xf32>
    %28 = vector.shape_cast %27 : vector<16xf32> to vector<16x1xf32>
    %cst_10 = arith.constant 3.200000e+01 : f32
    %29 = vector.broadcast %cst_10 : f32 to vector<16x1xf32>
    %30 = arith.divf %28, %29 : vector<16x1xf32>
    %31 = arith.mulf %25, %25 : vector<16x1xf32>
    %32 = arith.subf %30, %31 : vector<16x1xf32>
    %cst_11 = arith.constant 0.000000e+00 : f32
    %33 = vector.broadcast %cst_11 : f32 to vector<16x1xf32>
    %34 = arith.maximumf %32, %33 : vector<16x1xf32>
    %35 = vector.broadcast %25 : vector<16x1xf32> to vector<16x32xf32>
    %36 = arith.subf %21, %35 : vector<16x32xf32>
    %cst_12 = arith.constant 9.99999996E-13 : f32
    %37 = vector.broadcast %cst_12 : f32 to vector<16x1xf32>
    %38 = arith.addf %34, %37 : vector<16x1xf32>
    %39 = math.rsqrt %38 : vector<16x1xf32>
    %40 = vector.broadcast %39 : vector<16x1xf32> to vector<16x32xf32>
    %41 = arith.mulf %36, %40 : vector<16x32xf32>
    %42 = vector.shape_cast %2 : vector<32xf32> to vector<1x32xf32>
    %43 = vector.broadcast %42 : vector<1x32xf32> to vector<16x32xf32>
    %44 = arith.mulf %41, %43 : vector<16x32xf32>
    %45 = vector.shape_cast %4 : vector<32xf32> to vector<1x32xf32>
    %46 = vector.broadcast %45 : vector<1x32xf32> to vector<16x32xf32>
    %47 = arith.addf %44, %46 : vector<16x32xf32>
    %c0_13 = arith.constant 0 : index
    %c0_14 = arith.constant 0 : index
    %48 = vector.load %arg2[%c0_13, %c0_14] : memref<2x8xf32, #tpu.memory_space<vmem>>, vector<2x8xf32>
    %cst_15 = arith.constant 1.000000e+00 : f32
    %49 = vector.broadcast %cst_15 : f32 to vector<2x8xf32>
    %50 = arith.subf %49, %48 : vector<2x8xf32>
    %51 = vector.shape_cast %50 : vector<2x8xf32> to vector<2x1x8xf32>
    %cst_16 = arith.constant -1.000000e+09 : f32
    %52 = vector.broadcast %cst_16 : f32 to vector<2x1x8xf32>
    %53 = arith.mulf %51, %52 : vector<2x1x8xf32>
    %54 = tpu.concatenate %53, %53 in 0 : vector<2x1x8xf32>, vector<2x1x8xf32> -> vector<4x1x8xf32>
    %c0_17 = arith.constant 0 : index
    %c0_18 = arith.constant 0 : index
    %c0_19 = arith.constant 0 : index
    %55 = vector.load %arg6[%c0_17, %c0_18, %c0_19] : memref<2x8x128xf32, #tpu.memory_space<vmem>>, vector<1x8x128xf32>
    %56 = vector.shape_cast %55 : vector<1x8x128xf32> to vector<8x128xf32>
    %c0_20 = arith.constant 0 : index
    %c0_21 = arith.constant 0 : index
    %c0_22 = arith.constant 0 : index
    %57 = vector.load %arg7[%c0_20, %c0_21, %c0_22] : memref<2x32x192xbf16, #tpu.memory_space<vmem>>, vector<1x32x192xbf16>
    %58 = vector.shape_cast %57 : vector<1x32x192xbf16> to vector<32x192xbf16>
    %59 = vector.extract_strided_slice %58 {offsets = [0, 0], sizes = [32, 96], strides = [1, 1]} : vector<32x192xbf16> to vector<32x96xbf16>
    %60 = vector.extract_strided_slice %58 {offsets = [0, 96], sizes = [32, 32], strides = [1, 1]} : vector<32x192xbf16> to vector<32x32xbf16>
    %61 = vector.extract_strided_slice %58 {offsets = [0, 128], sizes = [32, 64], strides = [1, 1]} : vector<32x192xbf16> to vector<32x64xbf16>
    %62 = vector.extract_strided_slice %56 {offsets = [0, 0], sizes = [1, 96], strides = [1, 1]} : vector<8x128xf32> to vector<1x96xf32>
    %63 = vector.shape_cast %62 : vector<1x96xf32> to vector<96xf32>
    %64 = vector.extract_strided_slice %56 {offsets = [1, 0], sizes = [1, 32], strides = [1, 1]} : vector<8x128xf32> to vector<1x32xf32>
    %65 = vector.shape_cast %64 : vector<1x32xf32> to vector<32xf32>
    %66 = vector.extract_strided_slice %56 {offsets = [2, 0], sizes = [1, 32], strides = [1, 1]} : vector<8x128xf32> to vector<1x32xf32>
    %67 = vector.shape_cast %66 : vector<1x32xf32> to vector<32xf32>
    %68 = vector.extract_strided_slice %56 {offsets = [3, 0], sizes = [1, 32], strides = [1, 1]} : vector<8x128xf32> to vector<1x32xf32>
    %69 = vector.shape_cast %68 : vector<1x32xf32> to vector<32xf32>
    %70 = vector.extract_strided_slice %56 {offsets = [4, 0], sizes = [1, 64], strides = [1, 1]} : vector<8x128xf32> to vector<1x64xf32>
    %71 = vector.shape_cast %70 : vector<1x64xf32> to vector<64xf32>
    %72 = vector.extract_strided_slice %56 {offsets = [5, 0], sizes = [1, 32], strides = [1, 1]} : vector<8x128xf32> to vector<1x32xf32>
    %73 = vector.shape_cast %72 : vector<1x32xf32> to vector<32xf32>
    %74 = vector.extract_strided_slice %56 {offsets = [6, 0], sizes = [1, 32], strides = [1, 1]} : vector<8x128xf32> to vector<1x32xf32>
    %75 = vector.shape_cast %74 : vector<1x32xf32> to vector<32xf32>
    %76 = vector.extract_strided_slice %56 {offsets = [7, 0], sizes = [1, 32], strides = [1, 1]} : vector<8x128xf32> to vector<1x32xf32>
    %77 = vector.shape_cast %76 : vector<1x32xf32> to vector<32xf32>
    %78 = arith.truncf %47 : vector<16x32xf32> to vector<16x32xbf16>
    %cst_23 = arith.constant dense<0.000000e+00> : vector<16x96xf32>
    %79 = tpu.matmul %78, %59, %cst_23 {dimension_numbers = #tpu.dot_dimension_numbers<[1], [0], [0], [1], [0, 0, 1, 1], [], []>} : vector<16x32xbf16>, vector<32x96xbf16>, vector<16x96xf32> -> vector<16x96xf32>
    %80 = vector.shape_cast %63 : vector<96xf32> to vector<1x96xf32>
    %81 = vector.broadcast %80 : vector<1x96xf32> to vector<16x96xf32>
    %82 = arith.addf %79, %81 : vector<16x96xf32>
    %83 = vector.shape_cast %82 : vector<16x96xf32> to vector<2x8x96xf32>
    %84 = vector.extract_strided_slice %83 {offsets = [0, 0, 0], sizes = [2, 8, 16], strides = [1, 1, 1]} : vector<2x8x96xf32> to vector<2x8x16xf32>
    %85 = vector.extract_strided_slice %83 {offsets = [0, 0, 16], sizes = [2, 8, 16], strides = [1, 1, 1]} : vector<2x8x96xf32> to vector<2x8x16xf32>
    %86 = tpu.concatenate %84, %85 in 0 : vector<2x8x16xf32>, vector<2x8x16xf32> -> vector<4x8x16xf32>
    %87 = arith.truncf %86 : vector<4x8x16xf32> to vector<4x8x16xbf16>
    %88 = vector.extract_strided_slice %83 {offsets = [0, 0, 32], sizes = [2, 8, 16], strides = [1, 1, 1]} : vector<2x8x96xf32> to vector<2x8x16xf32>
    %89 = vector.extract_strided_slice %83 {offsets = [0, 0, 48], sizes = [2, 8, 16], strides = [1, 1, 1]} : vector<2x8x96xf32> to vector<2x8x16xf32>
    %90 = tpu.concatenate %88, %89 in 0 : vector<2x8x16xf32>, vector<2x8x16xf32> -> vector<4x8x16xf32>
    %91 = arith.truncf %90 : vector<4x8x16xf32> to vector<4x8x16xbf16>
    %92 = vector.extract_strided_slice %83 {offsets = [0, 0, 64], sizes = [2, 8, 16], strides = [1, 1, 1]} : vector<2x8x96xf32> to vector<2x8x16xf32>
    %93 = vector.extract_strided_slice %83 {offsets = [0, 0, 80], sizes = [2, 8, 16], strides = [1, 1, 1]} : vector<2x8x96xf32> to vector<2x8x16xf32>
    %94 = tpu.concatenate %92, %93 in 0 : vector<2x8x16xf32>, vector<2x8x16xf32> -> vector<4x8x16xf32>
    %95 = arith.truncf %94 : vector<4x8x16xf32> to vector<4x8x16xbf16>
    "tpu.trace_start"() <{level = 10 : i32, message = "bqd,bkd->bqk"}> : () -> ()
    %cst_24 = arith.constant dense<0.000000e+00> : vector<4x8x8xf32>
    %96 = tpu.matmul %87, %91, %cst_24 {dimension_numbers = #tpu.dot_dimension_numbers<[2], [2], [1], [1], [0, 0, 0, 1, 1, 1], [0], [0]>} : vector<4x8x16xbf16>, vector<4x8x16xbf16>, vector<4x8x8xf32> -> vector<4x8x8xf32>
    "tpu.trace_stop"() : () -> ()
    %cst_25 = arith.constant 2.500000e-01 : f32
    %97 = vector.broadcast %cst_25 : f32 to vector<4x8x8xf32>
    %98 = arith.mulf %96, %97 : vector<4x8x8xf32>
    %99 = vector.broadcast %54 : vector<4x1x8xf32> to vector<4x8x8xf32>
    %100 = arith.addf %98, %99 : vector<4x8x8xf32>
    %cst_26 = arith.constant dense<0xFF800000> : vector<4x8xf32>
    %101 = vector.multi_reduction <maximumf>, %100, %cst_26 [2] : vector<4x8x8xf32> to vector<4x8xf32>
    %102 = vector.shape_cast %101 : vector<4x8xf32> to vector<4x8x1xf32>
    %103 = vector.broadcast %102 : vector<4x8x1xf32> to vector<4x8x8xf32>
    %104 = arith.subf %100, %103 : vector<4x8x8xf32>
    %105 = math.exp %104 : vector<4x8x8xf32>
    %cst_27 = arith.constant dense<0.000000e+00> : vector<4x8xf32>
    %106 = vector.multi_reduction <add>, %105, %cst_27 [2] : vector<4x8x8xf32> to vector<4x8xf32>
    %107 = vector.shape_cast %106 : vector<4x8xf32> to vector<4x8x1xf32>
    %108 = tpu.reciprocal %107 {approx = true} : vector<4x8x1xf32> -> vector<4x8x1xf32>
    %109 = vector.broadcast %108 : vector<4x8x1xf32> to vector<4x8x8xf32>
    %110 = arith.mulf %105, %109 : vector<4x8x8xf32>
    %111 = arith.truncf %110 : vector<4x8x8xf32> to vector<4x8x8xbf16>
    "tpu.trace_start"() <{level = 10 : i32, message = "bqk,bkd->bqd"}> : () -> ()
    %cst_28 = arith.constant dense<0.000000e+00> : vector<4x8x16xf32>
    %112 = tpu.matmul %111, %95, %cst_28 {dimension_numbers = #tpu.dot_dimension_numbers<[2], [1], [1], [2], [0, 0, 0, 1, 1, 2], [0], [0]>} : vector<4x8x8xbf16>, vector<4x8x16xbf16>, vector<4x8x16xf32> -> vector<4x8x16xf32>
    "tpu.trace_stop"() : () -> ()
    %113 = vector.extract_strided_slice %112 {offsets = [0, 0, 0], sizes = [2, 8, 16], strides = [1, 1, 1]} : vector<4x8x16xf32> to vector<2x8x16xf32>
    %114 = vector.extract_strided_slice %112 {offsets = [2, 0, 0], sizes = [2, 8, 16], strides = [1, 1, 1]} : vector<4x8x16xf32> to vector<2x8x16xf32>
    %115 = tpu.concatenate %113, %114 in 2 : vector<2x8x16xf32>, vector<2x8x16xf32> -> vector<2x8x32xf32>
    %116 = vector.shape_cast %115 : vector<2x8x32xf32> to vector<16x32xf32>
    %117 = arith.truncf %116 : vector<16x32xf32> to vector<16x32xbf16>
    %cst_29 = arith.constant dense<0.000000e+00> : vector<16x32xf32>
    %118 = tpu.matmul %117, %60, %cst_29 {dimension_numbers = #tpu.dot_dimension_numbers<[1], [0], [0], [1], [0, 0, 1, 1], [], []>} : vector<16x32xbf16>, vector<32x32xbf16>, vector<16x32xf32> -> vector<16x32xf32>
    %119 = vector.shape_cast %65 : vector<32xf32> to vector<1x32xf32>
    %120 = vector.broadcast %119 : vector<1x32xf32> to vector<16x32xf32>
    %121 = arith.addf %118, %120 : vector<16x32xf32>
    %122 = arith.addf %47, %121 : vector<16x32xf32>
    %cst_30 = arith.constant dense<0.000000e+00> : vector<16xf32>
    %123 = vector.multi_reduction <add>, %122, %cst_30 [1] : vector<16x32xf32> to vector<16xf32>
    %124 = vector.shape_cast %123 : vector<16xf32> to vector<16x1xf32>
    %cst_31 = arith.constant 3.200000e+01 : f32
    %125 = vector.broadcast %cst_31 : f32 to vector<16x1xf32>
    %126 = arith.divf %124, %125 : vector<16x1xf32>
    %127 = arith.mulf %122, %122 : vector<16x32xf32>
    %cst_32 = arith.constant dense<0.000000e+00> : vector<16xf32>
    %128 = vector.multi_reduction <add>, %127, %cst_32 [1] : vector<16x32xf32> to vector<16xf32>
    %129 = vector.shape_cast %128 : vector<16xf32> to vector<16x1xf32>
    %cst_33 = arith.constant 3.200000e+01 : f32
    %130 = vector.broadcast %cst_33 : f32 to vector<16x1xf32>
    %131 = arith.divf %129, %130 : vector<16x1xf32>
    %132 = arith.mulf %126, %126 : vector<16x1xf32>
    %133 = arith.subf %131, %132 : vector<16x1xf32>
    %cst_34 = arith.constant 0.000000e+00 : f32
    %134 = vector.broadcast %cst_34 : f32 to vector<16x1xf32>
    %135 = arith.maximumf %133, %134 : vector<16x1xf32>
    %136 = vector.broadcast %126 : vector<16x1xf32> to vector<16x32xf32>
    %137 = arith.subf %122, %136 : vector<16x32xf32>
    %cst_35 = arith.constant 9.99999996E-13 : f32
    %138 = vector.broadcast %cst_35 : f32 to vector<16x1xf32>
    %139 = arith.addf %135, %138 : vector<16x1xf32>
    %140 = math.rsqrt %139 : vector<16x1xf32>
    %141 = vector.broadcast %140 : vector<16x1xf32> to vector<16x32xf32>
    %142 = arith.mulf %137, %141 : vector<16x32xf32>
    %143 = vector.shape_cast %67 : vector<32xf32> to vector<1x32xf32>
    %144 = vector.broadcast %143 : vector<1x32xf32> to vector<16x32xf32>
    %145 = arith.mulf %142, %144 : vector<16x32xf32>
    %146 = vector.shape_cast %69 : vector<32xf32> to vector<1x32xf32>
    %147 = vector.broadcast %146 : vector<1x32xf32> to vector<16x32xf32>
    %148 = arith.addf %145, %147 : vector<16x32xf32>
    %149 = arith.truncf %148 : vector<16x32xf32> to vector<16x32xbf16>
    %cst_36 = arith.constant dense<0.000000e+00> : vector<16x64xf32>
    %150 = tpu.matmul %149, %61, %cst_36 {dimension_numbers = #tpu.dot_dimension_numbers<[1], [0], [0], [1], [0, 0, 1, 1], [], []>} : vector<16x32xbf16>, vector<32x64xbf16>, vector<16x64xf32> -> vector<16x64xf32>
    %151 = vector.shape_cast %71 : vector<64xf32> to vector<1x64xf32>
    %152 = vector.broadcast %151 : vector<1x64xf32> to vector<16x64xf32>
    %153 = arith.addf %150, %152 : vector<16x64xf32>
    %154 = arith.mulf %153, %153 : vector<16x64xf32>
    %155 = arith.mulf %153, %154 : vector<16x64xf32>
    %cst_37 = arith.constant 4.471500e-02 : f32
    %156 = vector.broadcast %cst_37 : f32 to vector<16x64xf32>
    %157 = arith.mulf %156, %155 : vector<16x64xf32>
    %158 = arith.addf %153, %157 : vector<16x64xf32>
    %cst_38 = arith.constant 0.797884583 : f32
    %159 = vector.broadcast %cst_38 : f32 to vector<16x64xf32>
    %160 = arith.mulf %159, %158 : vector<16x64xf32>
    %161 = math.tanh %160 : vector<16x64xf32>
    %cst_39 = arith.constant 1.000000e+00 : f32
    %162 = vector.broadcast %cst_39 : f32 to vector<16x64xf32>
    %163 = arith.addf %162, %161 : vector<16x64xf32>
    %cst_40 = arith.constant 5.000000e-01 : f32
    %164 = vector.broadcast %cst_40 : f32 to vector<16x64xf32>
    %165 = arith.mulf %164, %163 : vector<16x64xf32>
    %166 = arith.mulf %153, %165 : vector<16x64xf32>
    %167 = arith.truncf %166 : vector<16x64xf32> to vector<16x64xbf16>
    %c0_41 = arith.constant 0 : index
    %c0_42 = arith.constant 0 : index
    %c0_43 = arith.constant 0 : index
    %168 = vector.load %arg8[%c0_41, %c0_42, %c0_43] : memref<2x64x32xbf16, #tpu.memory_space<vmem>>, vector<1x64x32xbf16>
    %169 = vector.shape_cast %168 : vector<1x64x32xbf16> to vector<64x32xbf16>
    %cst_44 = arith.constant dense<0.000000e+00> : vector<16x32xf32>
    %170 = tpu.matmul %167, %169, %cst_44 {dimension_numbers = #tpu.dot_dimension_numbers<[1], [0], [0], [1], [0, 0, 1, 1], [], []>} : vector<16x64xbf16>, vector<64x32xbf16>, vector<16x32xf32> -> vector<16x32xf32>
    %171 = vector.shape_cast %73 : vector<32xf32> to vector<1x32xf32>
    %172 = vector.broadcast %171 : vector<1x32xf32> to vector<16x32xf32>
    %173 = arith.addf %170, %172 : vector<16x32xf32>
    %174 = arith.addf %148, %173 : vector<16x32xf32>
    %cst_45 = arith.constant dense<0.000000e+00> : vector<16xf32>
    %175 = vector.multi_reduction <add>, %174, %cst_45 [1] : vector<16x32xf32> to vector<16xf32>
    %176 = vector.shape_cast %175 : vector<16xf32> to vector<16x1xf32>
    %cst_46 = arith.constant 3.200000e+01 : f32
    %177 = vector.broadcast %cst_46 : f32 to vector<16x1xf32>
    %178 = arith.divf %176, %177 : vector<16x1xf32>
    %179 = arith.mulf %174, %174 : vector<16x32xf32>
    %cst_47 = arith.constant dense<0.000000e+00> : vector<16xf32>
    %180 = vector.multi_reduction <add>, %179, %cst_47 [1] : vector<16x32xf32> to vector<16xf32>
    %181 = vector.shape_cast %180 : vector<16xf32> to vector<16x1xf32>
    %cst_48 = arith.constant 3.200000e+01 : f32
    %182 = vector.broadcast %cst_48 : f32 to vector<16x1xf32>
    %183 = arith.divf %181, %182 : vector<16x1xf32>
    %184 = arith.mulf %178, %178 : vector<16x1xf32>
    %185 = arith.subf %183, %184 : vector<16x1xf32>
    %cst_49 = arith.constant 0.000000e+00 : f32
    %186 = vector.broadcast %cst_49 : f32 to vector<16x1xf32>
    %187 = arith.maximumf %185, %186 : vector<16x1xf32>
    %188 = vector.broadcast %178 : vector<16x1xf32> to vector<16x32xf32>
    %189 = arith.subf %174, %188 : vector<16x32xf32>
    %cst_50 = arith.constant 9.99999996E-13 : f32
    %190 = vector.broadcast %cst_50 : f32 to vector<16x1xf32>
    %191 = arith.addf %187, %190 : vector<16x1xf32>
    %192 = math.rsqrt %191 : vector<16x1xf32>
    %193 = vector.broadcast %192 : vector<16x1xf32> to vector<16x32xf32>
    %194 = arith.mulf %189, %193 : vector<16x32xf32>
    %195 = vector.shape_cast %75 : vector<32xf32> to vector<1x32xf32>
    %196 = vector.broadcast %195 : vector<1x32xf32> to vector<16x32xf32>
    %197 = arith.mulf %194, %196 : vector<16x32xf32>
    %198 = vector.shape_cast %77 : vector<32xf32> to vector<1x32xf32>
    %199 = vector.broadcast %198 : vector<1x32xf32> to vector<16x32xf32>
    %200 = arith.addf %197, %199 : vector<16x32xf32>
    %c1 = arith.constant 1 : index
    %c0_51 = arith.constant 0 : index
    %c0_52 = arith.constant 0 : index
    %201 = vector.load %arg6[%c1, %c0_51, %c0_52] : memref<2x8x128xf32, #tpu.memory_space<vmem>>, vector<1x8x128xf32>
    %202 = vector.shape_cast %201 : vector<1x8x128xf32> to vector<8x128xf32>
    %c1_53 = arith.constant 1 : index
    %c0_54 = arith.constant 0 : index
    %c0_55 = arith.constant 0 : index
    %203 = vector.load %arg7[%c1_53, %c0_54, %c0_55] : memref<2x32x192xbf16, #tpu.memory_space<vmem>>, vector<1x32x192xbf16>
    %204 = vector.shape_cast %203 : vector<1x32x192xbf16> to vector<32x192xbf16>
    %205 = vector.extract_strided_slice %204 {offsets = [0, 0], sizes = [32, 96], strides = [1, 1]} : vector<32x192xbf16> to vector<32x96xbf16>
    %206 = vector.extract_strided_slice %204 {offsets = [0, 96], sizes = [32, 32], strides = [1, 1]} : vector<32x192xbf16> to vector<32x32xbf16>
    %207 = vector.extract_strided_slice %204 {offsets = [0, 128], sizes = [32, 64], strides = [1, 1]} : vector<32x192xbf16> to vector<32x64xbf16>
    %208 = vector.extract_strided_slice %202 {offsets = [0, 0], sizes = [1, 96], strides = [1, 1]} : vector<8x128xf32> to vector<1x96xf32>
    %209 = vector.shape_cast %208 : vector<1x96xf32> to vector<96xf32>
    %210 = vector.extract_strided_slice %202 {offsets = [1, 0], sizes = [1, 32], strides = [1, 1]} : vector<8x128xf32> to vector<1x32xf32>
    %211 = vector.shape_cast %210 : vector<1x32xf32> to vector<32xf32>
    %212 = vector.extract_strided_slice %202 {offsets = [2, 0], sizes = [1, 32], strides = [1, 1]} : vector<8x128xf32> to vector<1x32xf32>
    %213 = vector.shape_cast %212 : vector<1x32xf32> to vector<32xf32>
    %214 = vector.extract_strided_slice %202 {offsets = [3, 0], sizes = [1, 32], strides = [1, 1]} : vector<8x128xf32> to vector<1x32xf32>
    %215 = vector.shape_cast %214 : vector<1x32xf32> to vector<32xf32>
    %216 = vector.extract_strided_slice %202 {offsets = [4, 0], sizes = [1, 64], strides = [1, 1]} : vector<8x128xf32> to vector<1x64xf32>
    %217 = vector.shape_cast %216 : vector<1x64xf32> to vector<64xf32>
    %218 = vector.extract_strided_slice %202 {offsets = [5, 0], sizes = [1, 32], strides = [1, 1]} : vector<8x128xf32> to vector<1x32xf32>
    %219 = vector.shape_cast %218 : vector<1x32xf32> to vector<32xf32>
    %220 = vector.extract_strided_slice %202 {offsets = [6, 0], sizes = [1, 32], strides = [1, 1]} : vector<8x128xf32> to vector<1x32xf32>
    %221 = vector.shape_cast %220 : vector<1x32xf32> to vector<32xf32>
    %222 = vector.extract_strided_slice %202 {offsets = [7, 0], sizes = [1, 32], strides = [1, 1]} : vector<8x128xf32> to vector<1x32xf32>
    %223 = vector.shape_cast %222 : vector<1x32xf32> to vector<32xf32>
    %224 = arith.truncf %200 : vector<16x32xf32> to vector<16x32xbf16>
    %cst_56 = arith.constant dense<0.000000e+00> : vector<16x96xf32>
    %225 = tpu.matmul %224, %205, %cst_56 {dimension_numbers = #tpu.dot_dimension_numbers<[1], [0], [0], [1], [0, 0, 1, 1], [], []>} : vector<16x32xbf16>, vector<32x96xbf16>, vector<16x96xf32> -> vector<16x96xf32>
    %226 = vector.shape_cast %209 : vector<96xf32> to vector<1x96xf32>
    %227 = vector.broadcast %226 : vector<1x96xf32> to vector<16x96xf32>
    %228 = arith.addf %225, %227 : vector<16x96xf32>
    %229 = vector.shape_cast %228 : vector<16x96xf32> to vector<2x8x96xf32>
    %230 = vector.extract_strided_slice %229 {offsets = [0, 0, 0], sizes = [2, 8, 16], strides = [1, 1, 1]} : vector<2x8x96xf32> to vector<2x8x16xf32>
    %231 = vector.extract_strided_slice %229 {offsets = [0, 0, 16], sizes = [2, 8, 16], strides = [1, 1, 1]} : vector<2x8x96xf32> to vector<2x8x16xf32>
    %232 = tpu.concatenate %230, %231 in 0 : vector<2x8x16xf32>, vector<2x8x16xf32> -> vector<4x8x16xf32>
    %233 = arith.truncf %232 : vector<4x8x16xf32> to vector<4x8x16xbf16>
    %234 = vector.extract_strided_slice %229 {offsets = [0, 0, 32], sizes = [2, 8, 16], strides = [1, 1, 1]} : vector<2x8x96xf32> to vector<2x8x16xf32>
    %235 = vector.extract_strided_slice %229 {offsets = [0, 0, 48], sizes = [2, 8, 16], strides = [1, 1, 1]} : vector<2x8x96xf32> to vector<2x8x16xf32>
    %236 = tpu.concatenate %234, %235 in 0 : vector<2x8x16xf32>, vector<2x8x16xf32> -> vector<4x8x16xf32>
    %237 = arith.truncf %236 : vector<4x8x16xf32> to vector<4x8x16xbf16>
    %238 = vector.extract_strided_slice %229 {offsets = [0, 0, 64], sizes = [2, 8, 16], strides = [1, 1, 1]} : vector<2x8x96xf32> to vector<2x8x16xf32>
    %239 = vector.extract_strided_slice %229 {offsets = [0, 0, 80], sizes = [2, 8, 16], strides = [1, 1, 1]} : vector<2x8x96xf32> to vector<2x8x16xf32>
    %240 = tpu.concatenate %238, %239 in 0 : vector<2x8x16xf32>, vector<2x8x16xf32> -> vector<4x8x16xf32>
    %241 = arith.truncf %240 : vector<4x8x16xf32> to vector<4x8x16xbf16>
    "tpu.trace_start"() <{level = 10 : i32, message = "bqd,bkd->bqk"}> : () -> ()
    %cst_57 = arith.constant dense<0.000000e+00> : vector<4x8x8xf32>
    %242 = tpu.matmul %233, %237, %cst_57 {dimension_numbers = #tpu.dot_dimension_numbers<[2], [2], [1], [1], [0, 0, 0, 1, 1, 1], [0], [0]>} : vector<4x8x16xbf16>, vector<4x8x16xbf16>, vector<4x8x8xf32> -> vector<4x8x8xf32>
    "tpu.trace_stop"() : () -> ()
    %cst_58 = arith.constant 2.500000e-01 : f32
    %243 = vector.broadcast %cst_58 : f32 to vector<4x8x8xf32>
    %244 = arith.mulf %242, %243 : vector<4x8x8xf32>
    %245 = vector.broadcast %54 : vector<4x1x8xf32> to vector<4x8x8xf32>
    %246 = arith.addf %244, %245 : vector<4x8x8xf32>
    %cst_59 = arith.constant dense<0xFF800000> : vector<4x8xf32>
    %247 = vector.multi_reduction <maximumf>, %246, %cst_59 [2] : vector<4x8x8xf32> to vector<4x8xf32>
    %248 = vector.shape_cast %247 : vector<4x8xf32> to vector<4x8x1xf32>
    %249 = vector.broadcast %248 : vector<4x8x1xf32> to vector<4x8x8xf32>
    %250 = arith.subf %246, %249 : vector<4x8x8xf32>
    %251 = math.exp %250 : vector<4x8x8xf32>
    %cst_60 = arith.constant dense<0.000000e+00> : vector<4x8xf32>
    %252 = vector.multi_reduction <add>, %251, %cst_60 [2] : vector<4x8x8xf32> to vector<4x8xf32>
    %253 = vector.shape_cast %252 : vector<4x8xf32> to vector<4x8x1xf32>
    %254 = tpu.reciprocal %253 {approx = true} : vector<4x8x1xf32> -> vector<4x8x1xf32>
    %255 = vector.broadcast %254 : vector<4x8x1xf32> to vector<4x8x8xf32>
    %256 = arith.mulf %251, %255 : vector<4x8x8xf32>
    %257 = arith.truncf %256 : vector<4x8x8xf32> to vector<4x8x8xbf16>
    "tpu.trace_start"() <{level = 10 : i32, message = "bqk,bkd->bqd"}> : () -> ()
    %cst_61 = arith.constant dense<0.000000e+00> : vector<4x8x16xf32>
    %258 = tpu.matmul %257, %241, %cst_61 {dimension_numbers = #tpu.dot_dimension_numbers<[2], [1], [1], [2], [0, 0, 0, 1, 1, 2], [0], [0]>} : vector<4x8x8xbf16>, vector<4x8x16xbf16>, vector<4x8x16xf32> -> vector<4x8x16xf32>
    "tpu.trace_stop"() : () -> ()
    %259 = vector.extract_strided_slice %258 {offsets = [0, 0, 0], sizes = [2, 8, 16], strides = [1, 1, 1]} : vector<4x8x16xf32> to vector<2x8x16xf32>
    %260 = vector.extract_strided_slice %258 {offsets = [2, 0, 0], sizes = [2, 8, 16], strides = [1, 1, 1]} : vector<4x8x16xf32> to vector<2x8x16xf32>
    %261 = tpu.concatenate %259, %260 in 2 : vector<2x8x16xf32>, vector<2x8x16xf32> -> vector<2x8x32xf32>
    %262 = vector.shape_cast %261 : vector<2x8x32xf32> to vector<16x32xf32>
    %263 = arith.truncf %262 : vector<16x32xf32> to vector<16x32xbf16>
    %cst_62 = arith.constant dense<0.000000e+00> : vector<16x32xf32>
    %264 = tpu.matmul %263, %206, %cst_62 {dimension_numbers = #tpu.dot_dimension_numbers<[1], [0], [0], [1], [0, 0, 1, 1], [], []>} : vector<16x32xbf16>, vector<32x32xbf16>, vector<16x32xf32> -> vector<16x32xf32>
    %265 = vector.shape_cast %211 : vector<32xf32> to vector<1x32xf32>
    %266 = vector.broadcast %265 : vector<1x32xf32> to vector<16x32xf32>
    %267 = arith.addf %264, %266 : vector<16x32xf32>
    %268 = arith.addf %200, %267 : vector<16x32xf32>
    %cst_63 = arith.constant dense<0.000000e+00> : vector<16xf32>
    %269 = vector.multi_reduction <add>, %268, %cst_63 [1] : vector<16x32xf32> to vector<16xf32>
    %270 = vector.shape_cast %269 : vector<16xf32> to vector<16x1xf32>
    %cst_64 = arith.constant 3.200000e+01 : f32
    %271 = vector.broadcast %cst_64 : f32 to vector<16x1xf32>
    %272 = arith.divf %270, %271 : vector<16x1xf32>
    %273 = arith.mulf %268, %268 : vector<16x32xf32>
    %cst_65 = arith.constant dense<0.000000e+00> : vector<16xf32>
    %274 = vector.multi_reduction <add>, %273, %cst_65 [1] : vector<16x32xf32> to vector<16xf32>
    %275 = vector.shape_cast %274 : vector<16xf32> to vector<16x1xf32>
    %cst_66 = arith.constant 3.200000e+01 : f32
    %276 = vector.broadcast %cst_66 : f32 to vector<16x1xf32>
    %277 = arith.divf %275, %276 : vector<16x1xf32>
    %278 = arith.mulf %272, %272 : vector<16x1xf32>
    %279 = arith.subf %277, %278 : vector<16x1xf32>
    %cst_67 = arith.constant 0.000000e+00 : f32
    %280 = vector.broadcast %cst_67 : f32 to vector<16x1xf32>
    %281 = arith.maximumf %279, %280 : vector<16x1xf32>
    %282 = vector.broadcast %272 : vector<16x1xf32> to vector<16x32xf32>
    %283 = arith.subf %268, %282 : vector<16x32xf32>
    %cst_68 = arith.constant 9.99999996E-13 : f32
    %284 = vector.broadcast %cst_68 : f32 to vector<16x1xf32>
    %285 = arith.addf %281, %284 : vector<16x1xf32>
    %286 = math.rsqrt %285 : vector<16x1xf32>
    %287 = vector.broadcast %286 : vector<16x1xf32> to vector<16x32xf32>
    %288 = arith.mulf %283, %287 : vector<16x32xf32>
    %289 = vector.shape_cast %213 : vector<32xf32> to vector<1x32xf32>
    %290 = vector.broadcast %289 : vector<1x32xf32> to vector<16x32xf32>
    %291 = arith.mulf %288, %290 : vector<16x32xf32>
    %292 = vector.shape_cast %215 : vector<32xf32> to vector<1x32xf32>
    %293 = vector.broadcast %292 : vector<1x32xf32> to vector<16x32xf32>
    %294 = arith.addf %291, %293 : vector<16x32xf32>
    %295 = arith.truncf %294 : vector<16x32xf32> to vector<16x32xbf16>
    %cst_69 = arith.constant dense<0.000000e+00> : vector<16x64xf32>
    %296 = tpu.matmul %295, %207, %cst_69 {dimension_numbers = #tpu.dot_dimension_numbers<[1], [0], [0], [1], [0, 0, 1, 1], [], []>} : vector<16x32xbf16>, vector<32x64xbf16>, vector<16x64xf32> -> vector<16x64xf32>
    %297 = vector.shape_cast %217 : vector<64xf32> to vector<1x64xf32>
    %298 = vector.broadcast %297 : vector<1x64xf32> to vector<16x64xf32>
    %299 = arith.addf %296, %298 : vector<16x64xf32>
    %300 = arith.mulf %299, %299 : vector<16x64xf32>
    %301 = arith.mulf %299, %300 : vector<16x64xf32>
    %cst_70 = arith.constant 4.471500e-02 : f32
    %302 = vector.broadcast %cst_70 : f32 to vector<16x64xf32>
    %303 = arith.mulf %302, %301 : vector<16x64xf32>
    %304 = arith.addf %299, %303 : vector<16x64xf32>
    %cst_71 = arith.constant 0.797884583 : f32
    %305 = vector.broadcast %cst_71 : f32 to vector<16x64xf32>
    %306 = arith.mulf %305, %304 : vector<16x64xf32>
    %307 = math.tanh %306 : vector<16x64xf32>
    %cst_72 = arith.constant 1.000000e+00 : f32
    %308 = vector.broadcast %cst_72 : f32 to vector<16x64xf32>
    %309 = arith.addf %308, %307 : vector<16x64xf32>
    %cst_73 = arith.constant 5.000000e-01 : f32
    %310 = vector.broadcast %cst_73 : f32 to vector<16x64xf32>
    %311 = arith.mulf %310, %309 : vector<16x64xf32>
    %312 = arith.mulf %299, %311 : vector<16x64xf32>
    %313 = arith.truncf %312 : vector<16x64xf32> to vector<16x64xbf16>
    %c1_74 = arith.constant 1 : index
    %c0_75 = arith.constant 0 : index
    %c0_76 = arith.constant 0 : index
    %314 = vector.load %arg8[%c1_74, %c0_75, %c0_76] : memref<2x64x32xbf16, #tpu.memory_space<vmem>>, vector<1x64x32xbf16>
    %315 = vector.shape_cast %314 : vector<1x64x32xbf16> to vector<64x32xbf16>
    %cst_77 = arith.constant dense<0.000000e+00> : vector<16x32xf32>
    %316 = tpu.matmul %313, %315, %cst_77 {dimension_numbers = #tpu.dot_dimension_numbers<[1], [0], [0], [1], [0, 0, 1, 1], [], []>} : vector<16x64xbf16>, vector<64x32xbf16>, vector<16x32xf32> -> vector<16x32xf32>
    %317 = vector.shape_cast %219 : vector<32xf32> to vector<1x32xf32>
    %318 = vector.broadcast %317 : vector<1x32xf32> to vector<16x32xf32>
    %319 = arith.addf %316, %318 : vector<16x32xf32>
    %320 = arith.addf %294, %319 : vector<16x32xf32>
    %cst_78 = arith.constant dense<0.000000e+00> : vector<16xf32>
    %321 = vector.multi_reduction <add>, %320, %cst_78 [1] : vector<16x32xf32> to vector<16xf32>
    %322 = vector.shape_cast %321 : vector<16xf32> to vector<16x1xf32>
    %cst_79 = arith.constant 3.200000e+01 : f32
    %323 = vector.broadcast %cst_79 : f32 to vector<16x1xf32>
    %324 = arith.divf %322, %323 : vector<16x1xf32>
    %325 = arith.mulf %320, %320 : vector<16x32xf32>
    %cst_80 = arith.constant dense<0.000000e+00> : vector<16xf32>
    %326 = vector.multi_reduction <add>, %325, %cst_80 [1] : vector<16x32xf32> to vector<16xf32>
    %327 = vector.shape_cast %326 : vector<16xf32> to vector<16x1xf32>
    %cst_81 = arith.constant 3.200000e+01 : f32
    %328 = vector.broadcast %cst_81 : f32 to vector<16x1xf32>
    %329 = arith.divf %327, %328 : vector<16x1xf32>
    %330 = arith.mulf %324, %324 : vector<16x1xf32>
    %331 = arith.subf %329, %330 : vector<16x1xf32>
    %cst_82 = arith.constant 0.000000e+00 : f32
    %332 = vector.broadcast %cst_82 : f32 to vector<16x1xf32>
    %333 = arith.maximumf %331, %332 : vector<16x1xf32>
    %334 = vector.broadcast %324 : vector<16x1xf32> to vector<16x32xf32>
    %335 = arith.subf %320, %334 : vector<16x32xf32>
    %cst_83 = arith.constant 9.99999996E-13 : f32
    %336 = vector.broadcast %cst_83 : f32 to vector<16x1xf32>
    %337 = arith.addf %333, %336 : vector<16x1xf32>
    %338 = math.rsqrt %337 : vector<16x1xf32>
    %339 = vector.broadcast %338 : vector<16x1xf32> to vector<16x32xf32>
    %340 = arith.mulf %335, %339 : vector<16x32xf32>
    %341 = vector.shape_cast %221 : vector<32xf32> to vector<1x32xf32>
    %342 = vector.broadcast %341 : vector<1x32xf32> to vector<16x32xf32>
    %343 = arith.mulf %340, %342 : vector<16x32xf32>
    %344 = vector.shape_cast %223 : vector<32xf32> to vector<1x32xf32>
    %345 = vector.broadcast %344 : vector<1x32xf32> to vector<16x32xf32>
    %346 = arith.addf %343, %345 : vector<16x32xf32>
    %347 = arith.truncf %346 : vector<16x32xf32> to vector<16x32xbf16>
    %c0_84 = arith.constant 0 : index
    %c0_85 = arith.constant 0 : index
    %348 = vector.load %arg9[%c0_84, %c0_85] : memref<32x128xbf16, #tpu.memory_space<vmem>>, vector<32x128xbf16>
    %cst_86 = arith.constant dense<0.000000e+00> : vector<16x128xf32>
    %349 = tpu.matmul %347, %348, %cst_86 {dimension_numbers = #tpu.dot_dimension_numbers<[1], [0], [0], [1], [0, 0, 1, 1], [], []>} : vector<16x32xbf16>, vector<32x128xbf16>, vector<16x128xf32> -> vector<16x128xf32>
    %350 = vector.shape_cast %6 : vector<128xf32> to vector<1x128xf32>
    %351 = vector.broadcast %350 : vector<1x128xf32> to vector<16x128xf32>
    %352 = arith.addf %349, %351 : vector<16x128xf32>
    %c0_87 = arith.constant 0 : index
    %c0_88 = arith.constant 0 : index
    %353 = vector.load %arg10[%c0_87, %c0_88] : memref<16x128xf32, #tpu.memory_space<vmem>>, vector<16x128xf32>
    tpu.vector_store %arg10[%c0_87, %c0_88], %352 {strides = array<i32>} : memref<16x128xf32, #tpu.memory_space<vmem>>, vector<16x128xf32>,
    %cst_89 = arith.constant dense<0xFF800000> : vector<16xf32>
    %354 = vector.multi_reduction <maximumf>, %352, %cst_89 [1] : vector<16x128xf32> to vector<16xf32>
    %355 = vector.shape_cast %354 : vector<16xf32> to vector<16x1xf32>
    %356 = vector.broadcast %355 : vector<16x1xf32> to vector<16x128xf32>
    %357 = arith.subf %352, %356 : vector<16x128xf32>
    %358 = math.exp %357 : vector<16x128xf32>
    %cst_90 = arith.constant dense<0.000000e+00> : vector<16xf32>
    %359 = vector.multi_reduction <add>, %358, %cst_90 [1] : vector<16x128xf32> to vector<16xf32>
    %360 = vector.shape_cast %359 : vector<16xf32> to vector<16x1xf32>
    %361 = math.log %360 : vector<16x1xf32>
    %362 = vector.broadcast %361 : vector<16x1xf32> to vector<16x128xf32>
    %363 = arith.subf %357, %362 : vector<16x128xf32>
    %c0_91 = arith.constant 0 : index
    %c0_92 = arith.constant 0 : index
    %364 = vector.load %arg1[%c0_91, %c0_92] : memref<16x1xi32, #tpu.memory_space<vmem>>, vector<16x1xi32>
    %c0_i32 = arith.constant 0 : i32
    %365 = vector.broadcast %c0_i32 : i32 to vector<16x1xi32>
    %366 = arith.cmpi sge, %364, %365 : vector<16x1xi32>
    %367 = arith.extui %366 : vector<16x1xi1> to vector<16x1xi32>
    %368 = arith.sitofp %367 : vector<16x1xi32> to vector<16x1xf32>
    %c0_i32_93 = arith.constant 0 : i32
    %369 = vector.broadcast %c0_i32_93 : i32 to vector<16x1xi32>
    %370 = arith.cmpi sge, %364, %369 : vector<16x1xi32>
    %c0_i32_94 = arith.constant 0 : i32
    %371 = vector.broadcast %c0_i32_94 : i32 to vector<16x1xi32>
    %372 = arith.select %370, %364, %371 : vector<16x1xi1>, vector<16x1xi32>
    %373 = tpu.iota {dimensions = array<i32: 1>} : vector<16x128xi32>
    %374 = vector.broadcast %372 : vector<16x1xi32> to vector<16x128xi32>
    %375 = arith.cmpi eq, %374, %373 : vector<16x128xi32>
    %376 = arith.extui %375 : vector<16x128xi1> to vector<16x128xi32>
    %377 = arith.sitofp %376 : vector<16x128xi32> to vector<16x128xf32>
    %378 = arith.mulf %377, %363 : vector<16x128xf32>
    %cst_95 = arith.constant dense<0.000000e+00> : vector<16xf32>
    %379 = vector.multi_reduction <add>, %378, %cst_95 [1] : vector<16x128xf32> to vector<16xf32>
    %380 = vector.shape_cast %379 : vector<16xf32> to vector<16x1xf32>
    %cst_96 = arith.constant 0.000000e+00 : f32
    %381 = vector.broadcast %cst_96 : f32 to vector<16x1xf32>
    %382 = arith.subf %381, %380 : vector<16x1xf32>
    %383 = arith.mulf %382, %368 : vector<16x1xf32>
    %384 = vector.shape_cast %383 : vector<16x1xf32> to vector<1x16x1xf32>
    %cst_97 = arith.constant dense<0.000000e+00> : vector<1xf32>
    %385 = vector.multi_reduction <add>, %384, %cst_97 [1, 2] : vector<1x16x1xf32> to vector<1xf32>
    %386 = vector.shape_cast %385 : vector<1xf32> to vector<1x1x1xf32>
    %387 = vector.extract %386[0, 0, 0] : f32 from vector<1x1x1xf32>
    %388 = vector.shape_cast %368 : vector<16x1xf32> to vector<1x16x1xf32>
    %cst_98 = arith.constant dense<0.000000e+00> : vector<1xf32>
    %389 = vector.multi_reduction <add>, %388, %cst_98 [1, 2] : vector<1x16x1xf32> to vector<1xf32>
    %390 = vector.shape_cast %389 : vector<1xf32> to vector<1x1x1xf32>
    %391 = vector.extract %390[0, 0, 0] : f32 from vector<1x1x1xf32>
    %cst_99 = arith.constant 1.000000e+00 : f32
    %392 = arith.maximumf %391, %cst_99 : f32
    %393 = arith.divf %387, %392 : f32
    %c0_100 = arith.constant 0 : index
    %c0_101 = arith.constant 0 : index
    %394 = memref.load %arg11[%c0_100, %c0_101] : memref<1x1xf32, #tpu.memory_space<smem>>
    memref.store %393, %arg11[%c0_100, %c0_101] : memref<1x1xf32, #tpu.memory_space<smem>>
    return
  }
}

</mosaic_0001>

<bundles_post_ra>
// kernel: tpu_custom_call.1
= control target key start
LH: loop header
LB: loop body
LE: loop exit
PB: predicated region body
PF: predicated region fallthrough
CT: control target
= control target key end

     0   :  { %17 = vsyncpa [#allocation3], 0  ;;  %v2630_v1 = vmov 0   ;;  %v2631_v2 = vmov 0.0   ;;  %vm2632_vm0 = vmmov 0   ;;  %s3206_s0 = inlined_call_operand.vmem [shape: s32[16,1], index: 0, kind: input, shape index: {}]   ;;  %s3207_s1 = inlined_call_operand.vmem [shape: s32[16,1], index: 1, kind: input, shape index: {}]   ;;  %s3208_s2 = inlined_call_operand.vmem [shape: f32[2,8], index: 2, kind: input, shape index: {}]   ;;  %s3209_s3 = inlined_call_operand.vmem [shape: bf16[128,32], index: 3, kind: input, shape index: {}]   ;;  %s3210_s4 = inlined_call_operand.vmem [shape: f32[8,32], index: 4, kind: input, shape index: {}]   ;;  %s3211_s5 = inlined_call_operand.vmem [shape: f32[3,128], index: 5, kind: input, shape index: {}]   ;;  %s3212_s6 = inlined_call_operand.vmem [shape: f32[2,8,128], index: 6, kind: input, shape index: {}]   ;;  %s3213_s7 = inlined_call_operand.vmem [shape: bf16[2,32,192], index: 7, kind: input, shape index: {}]   ;;  %s3214_s8 = inlined_call_operand.vmem [shape: bf16[2,64,32], index: 8, kind: input, shape index: {}]   ;;  %s3215_s9 = inlined_call_operand.vmem [shape: bf16[32,128], index: 9, kind: input, shape index: {}]   ;;  %s3216_s10 = inlined_call_operand.hbm [shape: f32[16,128], index: 10, kind: output, shape index: {0}]   ;;  %s3217_s11 = inlined_call_operand.hbm [shape: f32[1,1], index: 11, kind: output, shape index: {1}]  }
   0x1   :  { %v41_v0 = vld [vmem:[%s3206_s0] sm:$0xff]  ;;  %2471 = vset.pattern.permute.xlu0 %v2630_v1  ;;  %2254 = vmatprep.subr.bf16.mxu0 %v2631_v2  ;;  %v42_v4 = vld [vmem:[%s3206_s0 + $0x8] sm:$0xff]  ;;  %v2495_v6 = vld [vmem:[%s3209_s3 + $0x10] sm:$0xff]  }
   0x2   :  { %v2493_v3 = vld [vmem:[%s3209_s3] sm:$0xff]   ;;  %46 = vperm.xlu0 %2471, %v41_v0   ;;  %2274 = vmatprep.subr.bf16.mxu1 %v2631_v2  ;;  %v2494_v5 = vld [vmem:[%s3209_s3 + $0x8] sm:$0xff]   ;;  %v2496_v7 = vld [vmem:[%s3209_s3 + $0x18] sm:$0xff]  }
   0x3   :  { %2255 = vmatpush3.bf16.msra.mxu0 %v2493_v3  ;;  %2492 = vset.pattern.permute.xlu1 %v2630_v1  ;;  %v2497_v8 = vld [vmem:[%s3209_s3 + $0x20] sm:$0xff]  }
   0x4   :  { %2256 = vmatprep.subr.bf16.mxu0 %v2631_v2  ;;  %2270 = vmatprep.mubr.msk.bf16.mxu0 %vm2632_vm0, %v2631_v2 }
   0x5   :  { %2278 = vmatprep.mubr.msk.bf16.mxu1 %vm2632_vm0, %v2631_v2 }
   0x6   :  { %49 = vperm.xlu0 %2471, %v42_v4  }
   0x7   :  { %2257 = vmatpush3.bf16.msra.mxu0 %v2494_v5 }
   0x8   :  { %2258 = vmatprep.subr.bf16.mxu0 %v2631_v2 }
   0xb   :  { %2259 = vmatpush3.bf16.msra.mxu0 %v2495_v6 }
   0xc   :  { %2260 = vmatprep.subr.bf16.mxu0 %v2631_v2 }
   0xf   :  { %2261 = vmatpush3.bf16.msra.mxu0 %v2496_v7 }
  0x10   :  { %2262 = vmatprep.subr.bf16.mxu0 %v2631_v2 }
  0x11   :  { %18 = vsyncpa [#allocation4], 0  ;;  %v2498_v9 = vld [vmem:[%s3209_s3 + $0x28] sm:$0xff]   ;;  %v2499_v10 = vld [vmem:[%s3209_s3 + $0x30] sm:$0xff]   ;;  %v43_v12 = vlaneseq  ;;  %v2633_v16 = vmov 1.0|1.0  }
  0x12   :  { %v2500_v11 = vld [vmem:[%s3209_s3 + $0x38] sm:$0xff]   ;;  %v163_v17 = vld [vmem:[%s3210_s4] sm:$0xff]  ;;  %vm166_vm4 = vcmask 261120   ;;  %s2634_s25 = smov 112   ;;  %s2635_s26 = smov 96   ;;  %vm322_vm5 = vcmask 130048  }
  0x13   :  { %2263 = vmatpush3.bf16.msra.mxu0 %v2497_v8  ;;  %v2749_v14 = vand.u32 127, %v43_v12  ;;  %v2765_v30 = vld [vmem:[%s3213_s7] ss:$8 sps:$4 sm:$0xff]   ;;  %v2771_v31 = vld [vmem:[%s3213_s7 + $0x10] ss:$8 sps:$4 sm:$0xff]   ;;  %v2776_v48 = vshrl.u32 %v43_v12, 7 }
  0x14   :  { %2264 = vmatprep.subr.bf16.mxu0 %v2631_v2  ;;  %2275 = vmatpush3.bf16.msra.mxu1 %v2765_v30  ;;  %v40_v51 = vld [vmem:[%s3211_s5] sm:$0x7]  ;;  %vm536_vm6 = vcmask 64512   ;;  %vm590_vm7 = vcmask 1043456   ;;  %s2638_s13 = smov 32   ;;  %s2639_s14 = smov 16  }
  0x15   :  { %2276 = vmatprep.subr.bf16.mxu1 %v2631_v2  ;;  %v2779_v49 = vsub.s32 0, %v2776_v48  ;;  %v2786_v55 = vsub.s32 1, %v2776_v48  ;;  %v2801_v1 = vld [vmem:[%s3212_s6] sm:$0xff]  ;;  %vm1001_vm8 = vcmask 523264   ;;  %vm2049_vm13 = vcmask 7168  }
  0x17   :  { %2265 = vmatpush3.bf16.msra.mxu0 %v2498_v9  ;;  %v203_v54 = vrot.slane %v40_v51, %v2779_v49  ;;  %v209_v60 = vrot.slane %v40_v51, %v2786_v55  ;;  %v250_v3 = vrot.slane %v2801_v1, %v2779_v49 }
  0x18   :  { %2266 = vmatprep.subr.bf16.mxu0 %v2631_v2  ;;  %2277 = vmatpush3.bf16.msra.mxu1 %v2771_v31 }
  0x19   :  { %2282 = vmatprep.subr.bf16.mxu1 %v2631_v2 }
  0x1b   :  { %2267 = vmatpush3.bf16.msra.mxu0 %v2499_v10 }
  0x1c   :  { %2268 = vmatprep.subr.bf16.mxu0 %v2631_v2 }
  0x1f   :  { %2269 = vmatpush3.bf16.msra.mxu0 %v2500_v11 }
  0x20   :  { %2300 = vmatprep.subr.bf16.mxu0 %v2631_v2 }
  0x81   :  { %v47_v13 = vpop.permute.xlu0 %46 }
  0x82   :  { %vm51_vm1 = vcmp.eq.s32.totalorder %v47_v13, %v2749_v14 }
  0x85   :  { %v50_v15 = vpop.permute.xlu0 %49 }
  0x86   :  { %vm52_vm2 = vcmp.eq.s32.totalorder %v50_v15, %v2749_v14 }
  0x87   :  { %vm2120_vm3 = vmpackc.low %vm52_vm2, %vm51_vm1 }
  0x88   :  { %2271 = vmatmul.mubr.msk.bf16.vlgmr.msra.gmra.mrb[0].mxu0 %vm2120_vm3, %v2633_v16 }
  0x89   :  { %2302 = vmatprep.mubr.msk.bf16.mxu0 %vm2632_vm0, %v2631_v2 }
 0x15b   :  { %v156_v18 = vpop.f32.mrb[0].mxu0 }
 0x15c   :  { %v164_v19 = vadd.f32 %v163_v17, %v156_v18  ;;  %v2272_v20 = vpop.f32.mrb[1].mxu0 }
 0x15d   :  { %v159_v21 = vpop.f32.mrb[2].mxu0 }
 0x15e   :  { %v165_v22 = vadd.f32 %v163_v17, %v159_v21  ;;  %v2273_v23 = vpop.f32.mrb[3].mxu0  ;;  %v167_v24 = vsel %vm166_vm4, %v164_v19, 0.0  ;;  %v176_v25 = vmul.f32 %v164_v19, %v164_v19 }
 0x15f   :  { %168 = vadd.xlane.f32.xlu1 %v167_v24 }
 0x160   :  { %v178_v26 = vsel %vm166_vm4, %v176_v25, 0.0  ;;  %v170_v27 = vsel %vm166_vm4, %v165_v22, 0.0  ;;  %v177_v28 = vmul.f32 %v165_v22, %v165_v22 }
 0x161   :  { %179 = vadd.xlane.f32.xlu0 %v178_v26 }
 0x162   :  { %v181_v29 = vsel %vm166_vm4, %v177_v28, 0.0 }
 0x163   :  { %171 = vadd.xlane.f32.xlu1 %v170_v27  ;;  %v2636_v27 = vmov 1966171168  }
 0x164   :  { %v216_v28 = vunpack.c.l.s4 %v2636_v27 }
 0x167   :  { %182 = vadd.xlane.f32.xlu1 %v181_v29  ;;  %v217_v29 = vunpack.c.0.s8 %v216_v28 }
 0x1ec   :  { %v169_v32 = vpop.xlane.xlu1 %168 }
 0x1ed   :  { %v174_v33 = vmul.f32 0.03125, %v169_v32  ;;  %v212_v32 = vld [vmem:[%s3208_s2] sm:$0x3]  ;;  %s2637_s2 = smov 64  }
 0x1ee   :  { %v180_v34 = vpop.xlane.xlu0 %179 }
 0x1ef   :  { %v186_v35 = vmul.f32 %v174_v33, %v174_v33  ;;  %v184_v36 = vmul.f32 0.03125, %v180_v34  ;;  %v192_v52 = vsub.f32 %v164_v19, %v174_v33  ;;  %v213_v33 = vsub.f32 1.0, %v212_v32 }
 0x1f0   :  { %v172_v37 = vpop.xlane.xlu1 %171  ;;  %v220_v34 = vsub.s32 %v217_v29, %v2776_v48 }
 0x1f1   :  { %v188_v38 = vsub.f32 %v184_v36, %v186_v35  ;;  %v175_v39 = vmul.f32 0.03125, %v172_v37 }
 0x1f2   :  { %v221_v35 = vrot.slane %v213_v33, %v220_v34 }
 0x1f3   :  { %v190_v40 = vmax.f32 %v188_v38, 0.0  ;;  %v187_v43 = vmul.f32 %v175_v39, %v175_v39  ;;  %v193_v56 = vsub.f32 %v165_v22, %v175_v39 }
 0x1f4   :  { %v183_v41 = vpop.xlane.xlu1 %182  ;;  %v229_v36 = vrot.slane %v221_v35, %v220_v34  ;;  %v222_v38 = vcombine.high %v221_v35, %v221_v35 }
 0x1f5   :  { %v194_v42 = vadd.f32 1e-12, %v190_v40  ;;  %v185_v44 = vmul.f32 0.03125, %v183_v41 }
 0x1f6   :  { %v239_v37 = vmul.f32 -1e+09, %v229_v36  ;;  %v236_v40 = vrot.slane %v222_v38, %v220_v34 }
 0x1f7   :  { %2523 = vrsqrt.f32 %v194_v42  ;;  %v189_v45 = vsub.f32 %v185_v44, %v187_v43 }
 0x1f8   :  { %v2851_v39 = vrot.slane %v239_v37, %v2779_v49 }
 0x1f9   :  { %v191_v46 = vmax.f32 %v189_v45, 0.0 }
 0x1fb   :  { %v195_v47 = vadd.f32 1e-12, %v191_v46 }
 0x1fd   :  { %2525 = vrsqrt.f32 %v195_v47  ;;  %v240_v47 = vmul.f32 -1e+09, %v236_v40 }
 0x1ff   :  { %v2856_v51 = vrot.slane %v240_v47, %v2779_v49 }
 0x201   :  { %v2524_v50 = vpop.eup %2523 }
 0x202   :  { %v198_v53 = vmul.f32 %v2524_v50, %v192_v52 }
 0x204   :  { %v204_v59 = vmul.f32 %v203_v54, %v198_v53 }
 0x206   :  { %v2789_v62 = vadd.f32 %v209_v60, %v204_v59 }
 0x207   :  { %v2526_v57 = vpop.eup %2525 }
 0x208   :  { %v199_v58 = vmul.f32 %v2526_v57, %v193_v56 }
 0x20a   :  { %v205_v61 = vmul.f32 %v203_v54, %v199_v58 }
 0x20c   :  { %v2791_v63 = vadd.f32 %v209_v60, %v205_v61 }
 0x20e   :  { %v246_v0 = vpack.c.bf16 %v2791_v63, %v2789_v62 }
 0x210   :  { %2279 = vmatmul.mubr.msk.bf16.vlgmr.msra.gmra.mrb[0].mxu1 %vm166_vm4, %v246_v0 }
 0x211   :  { %2284 = vmatprep.mubr.msk.bf16.mxu1 %vm2632_vm0, %v2631_v2 }
 0x2e3   :  { %v300_v4 = vpop.f32.mrb[0].mxu1 }
 0x2e4   :  { %v2280_v5 = vpop.f32.mrb[1].mxu1  ;;  %v301_v7 = vadd.f32 %v300_v4, %v250_v3 }
 0x2e5   :  { %v303_v6 = vpop.f32.mrb[2].mxu1 }
 0x2e6   :  { %v304_v8 = vadd.f32 %v303_v6, %v250_v3  ;;  %v2281_v9 = vpop.f32.mrb[3].mxu1  ;;  %v2806_v11 = vpack.c.bf16 %v301_v7, %v301_v7 }
 0x2e8   :  { %v2472_v10 = vpack.i.bf16 %v304_v8, %v301_v7  ;;  %v2810_v12 = vpack.c.bf16 %v304_v8, %v304_v8 }
 0x2ea   :  { %2473 = vrot.lane.b32.xlu1 %v2472_v10, %s2634_s25 }
 0x2ee   :  { %320 = vrot.lane.b32.xlu1 %v2806_v11, %s2635_s26 }
 0x2f2   :  { %370 = vrot.lane.b32.xlu1 %v2810_v12, %s2635_s26 }
 0x35c   :  { %v2474_v13 = vpop.permute.xlu1 %2473 }
 0x35d   :  { %v2476_v15 = vunpack.i.h.bf16 %v2474_v13  ;;  %v2475_v16 = vunpack.i.l.bf16 %v2474_v13 }
 0x35f   :  { %v2814_v17 = vpack.c.bf16 %v2476_v15, %v2476_v15  ;;  %v2816_v18 = vpack.c.bf16 %v2475_v16, %v2475_v16 }
 0x360   :  { %v321_v19 = vpop.permute.xlu1 %320 }
 0x361   :  { %v327_v20 = vsel %vm322_vm5, %v321_v19, 0  ;;  %468 = vrot.lane.b32.xlu0 %v2814_v17, %s2635_s26  ;;  %419 = vrot.lane.b32.xlu1 %v2816_v18, %s2635_s26 }
 0x362   :  { %2283 = vmatpush3.bf16.xpose.msra.mxu1 %v327_v20 }
 0x363   :  { %2288 = vmatprep.subr.bf16.mxu1 %v2631_v2 }
 0x364   :  { %v371_v21 = vpop.permute.xlu1 %370 }
 0x365   :  { %v376_v22 = vsel %vm322_vm5, %v371_v21, 0 }
 0x369   :  { %2285 = vmatmul.mubr.msk.bf16.vlgmr.msra.gmra.mrb[4].mxu1 %vm322_vm5, %v2806_v11 }
 0x36a   :  { %2289 = vmatpush3.bf16.xpose.msra.mxu1 %v376_v22  ;;  %2290 = vmatprep.mubr.msk.bf16.mxu1 %vm2632_vm0, %v2631_v2 }
 0x36b   :  { %2294 = vmatprep.subr.bf16.mxu1 %v2631_v2 }
 0x371   :  { %2291 = vmatmul.mubr.msk.bf16.vlgmr.msra.gmra.mrb[8].mxu1 %vm322_vm5, %v2810_v12 }
 0x372   :  { %2296 = vmatprep.mubr.msk.bf16.mxu1 %vm2632_vm0, %v2631_v2 }
 0x3d3   :  { %v469_v23 = vpop.permute.xlu0 %468  ;;  %v420_v24 = vpop.permute.xlu1 %419 }
 0x3d4   :  { %v474_v25 = vsel %vm322_vm5, %v469_v23, 0  ;;  %v425_v26 = vsel %vm322_vm5, %v420_v24, 0 }
 0x3d5   :  { %2295 = vmatpush3.bf16.xpose.msra.mxu1 %v425_v26  ;;  %2301 = vmatpush3.bf16.xpose.msra.mxu0 %v474_v25 }
 0x3d6   :  { %2306 = vmatprep.subr.bf16.mxu1 %v2631_v2  ;;  %2312 = vmatprep.subr.bf16.mxu0 %v2631_v2 }
 0x3dc   :  { %2297 = vmatmul.mubr.msk.bf16.vlgmr.msra.gmra.mrb[12].mxu1 %vm322_vm5, %v2816_v18  ;;  %2303 = vmatmul.mubr.msk.bf16.vlgmr.msra.gmra.mrb[4].mxu0 %vm322_vm5, %v2814_v17 }
 0x3dd   :  { %2308 = vmatprep.mubr.msk.bf16.mxu1 %vm2632_vm0, %v2631_v2  ;;  %2314 = vmatprep.mubr.msk.bf16.mxu0 %vm2632_vm0, %v2631_v2 }
 0x43c   :  { %v363_v41 = vpop.f32.mrb[4].mxu1 }
 0x43d   :  { %v516_v42 = vmul.f32 0.25, %v363_v41  ;;  %v2286_v43 = vpop.f32.mrb[5].mxu1 }
 0x43e   :  { %v366_v44 = vpop.f32.mrb[6].mxu1 }
 0x43f   :  { %v2287_v45 = vpop.f32.mrb[7].mxu1  ;;  %v532_v46 = vadd.f32 %v2851_v39, %v516_v42 }
 0x441   :  { %v537_v50 = vsel %vm536_vm6, %v532_v46, -inf }
 0x442   :  { %538 = vmax.xlane.f32.xlu1 %v537_v50 }
 0x444   :  { %v412_v52 = vpop.f32.mrb[8].mxu1 }
 0x445   :  { %v517_v53 = vmul.f32 0.25, %v412_v52  ;;  %v2292_v54 = vpop.f32.mrb[9].mxu1 }
 0x446   :  { %v415_v56 = vpop.f32.mrb[10].mxu1 }
 0x447   :  { %v2293_v57 = vpop.f32.mrb[11].mxu1  ;;  %v533_v58 = vadd.f32 %v2856_v51, %v517_v53 }
 0x449   :  { %v540_v59 = vsel %vm536_vm6, %v533_v58, -inf }
 0x44a   :  { %541 = vmax.xlane.f32.xlu0 %v540_v59 }
 0x460   :  { %585 = vrot.lane.b32.xlu0 %v2806_v11, %s2637_s2 }
 0x4af   :  { %v461_v60 = vpop.f32.mrb[12].mxu1  ;;  %v510_v61 = vpop.f32.mrb[4].mxu0 }
 0x4b0   :  { %v518_v0 = vmul.f32 0.25, %v461_v60  ;;  %v519_v3 = vmul.f32 0.25, %v510_v61  ;;  %v2298_v4 = vpop.f32.mrb[13].mxu1  ;;  %v2304_v5 = vpop.f32.mrb[5].mxu0 }
 0x4b1   :  { %v464_v6 = vpop.f32.mrb[14].mxu1  ;;  %v513_v7 = vpop.f32.mrb[6].mxu0  ;;  %v2503_v5 = vld [vmem:[%s3213_s7 + $0x4] ss:$8 sps:$4 sm:$0xff]  }
 0x4b2   :  { %v2299_v8 = vpop.f32.mrb[15].mxu1  ;;  %v2305_v9 = vpop.f32.mrb[7].mxu0  ;;  %v534_v10 = vadd.f32 %v2851_v39, %v518_v0  ;;  %v535_v15 = vadd.f32 %v2856_v51, %v519_v3  ;;  %v2506_v7 = vld [vmem:[%s3213_s7 + $0x14] ss:$8 sps:$4 sm:$0xff]  }
 0x4b4   :  { %v543_v13 = vsel %vm536_vm6, %v534_v10, -inf  ;;  %v546_v16 = vsel %vm536_vm6, %v535_v15, -inf }
 0x4b5   :  { %544 = vmax.xlane.f32.xlu1 %v543_v13 }
 0x4b9   :  { %547 = vmax.xlane.f32.xlu1 %v546_v16 }
 0x4ca   :  { %634 = vrot.lane.b32.xlu1 %v2810_v12, %s2637_s2 }
 0x4cf   :  { %v539_v11 = vpop.xlane.xlu1 %538 }
 0x4d0   :  { %v549_v20 = vsub.f32 %v532_v46, %v539_v11 }
 0x4d2   :  { %v553_v22 = vmul.f32 1.442695, %v549_v20 }
 0x4d4   :  { %2527 = vpow2.f32 %v553_v22 }
 0x4d7   :  { %v542_v19 = vpop.xlane.xlu0 %541 }
 0x4d8   :  { %v550_v23 = vsub.f32 %v533_v58, %v542_v19 }
 0x4da   :  { %v555_v25 = vmul.f32 1.442695, %v550_v23 }
 0x4db   :  { %v586_v21 = vpop.permute.xlu0 %585 }
 0x4dc   :  { %v592_v24 = vsel %vm590_vm7, %v586_v21, 0  ;;  %2529 = vpow2.f32 %v555_v25 }
 0x4dd   :  { %2307 = vmatpush3.bf16.msra.mxu1 %v592_v24 }
 0x4de   :  { %2318 = vmatprep.subr.bf16.mxu1 %v2631_v2  ;;  %v2528_v26 = vpop.eup %2527 }
 0x4df   :  { %v561_v27 = vsel %vm536_vm6, %v2528_v26, 0.0 }
 0x4e6   :  { %v2530_v28 = vpop.eup %2529 }
 0x4e7   :  { %v564_v12 = vsel %vm536_vm6, %v2530_v28, 0.0 }
 0x4ee   :  { %562 = vadd.xlane.f32.xlu1 %v561_v27 }
 0x4f2   :  { %565 = vadd.xlane.f32.xlu1 %v564_v12 }
 0x542   :  { %v545_v29 = vpop.xlane.xlu1 %544 }
 0x543   :  { %v551_v32 = vsub.f32 %v534_v10, %v545_v29 }
 0x545   :  { %v557_v33 = vmul.f32 1.442695, %v551_v32 }
 0x546   :  { %v548_v34 = vpop.xlane.xlu1 %547 }
 0x547   :  { %2531 = vpow2.f32 %v557_v33  ;;  %v552_v35 = vsub.f32 %v535_v15, %v548_v34 }
 0x549   :  { %v559_v36 = vmul.f32 1.442695, %v552_v35 }
 0x54a   :  { %v635_v37 = vpop.permute.xlu1 %634 }
 0x54b   :  { %2533 = vpow2.f32 %v559_v36  ;;  %v640_v38 = vsel %vm590_vm7, %v635_v37, 0  ;;  %v792_v36 = vrot.slane %v2801_v1, %v2786_v55 }
 0x54c   :  { %2313 = vmatpush3.bf16.msra.mxu0 %v640_v38 }
 0x54d   :  { %2324 = vmatprep.subr.bf16.mxu0 %v2631_v2 }
 0x551   :  { %v2532_v40 = vpop.eup %2531 }
 0x552   :  { %v567_v41 = vsel %vm536_vm6, %v2532_v40, 0.0 }
 0x553   :  { %568 = vadd.xlane.f32.xlu0 %v567_v41 }
 0x555   :  { %v2534_v42 = vpop.eup %2533 }
 0x556   :  { %v570_v43 = vsel %vm536_vm6, %v2534_v42, 0.0 }
 0x557   :  { %571 = vadd.xlane.f32.xlu1 %v570_v43 }
 0x568   :  { %682 = vrot.lane.b32.xlu1 %v2816_v18, %s2637_s2 }
 0x569   :  { %730 = vrot.lane.b32.xlu0 %v2814_v17, %s2637_s2 }
 0x56c   :  { %793 = vrot.lane.b32.xlu1 %v2765_v30, %s2638_s13 }
 0x570   :  { %795 = vrot.lane.b32.xlu1 %v2771_v31, %s2638_s13 }
 0x57b   :  { %v563_v44 = vpop.xlane.xlu1 %562 }
 0x57c   :  { %2535 = vrcp.f32 %v563_v44 }
 0x57f   :  { %v566_v45 = vpop.xlane.xlu1 %565 }
 0x580   :  { %2537 = vrcp.f32 %v566_v45 }
 0x586   :  { %v2536_v46 = vpop.eup %2535 }
 0x587   :  { %v577_v47 = vmul.f32 %v2536_v46, %v2528_v26 }
 0x589   :  { %v581_v50 = vpack.c.bf16 %v577_v47, %v577_v47 }
 0x58a   :  { %v2538_v52 = vpop.eup %2537 }
 0x58b   :  { %v578_v53 = vmul.f32 %v2538_v52, %v2530_v28  ;;  %2309 = vmatmul.mubr.msk.bf16.vlgmr.msra.gmra.mrb[16].mxu1 %vm536_vm6, %v581_v50 }
 0x58c   :  { %2320 = vmatprep.mubr.msk.bf16.mxu1 %vm2632_vm0, %v2631_v2 }
 0x58d   :  { %v582_v54 = vpack.c.bf16 %v578_v53, %v578_v53 }
 0x58f   :  { %2315 = vmatmul.mubr.msk.bf16.vlgmr.msra.gmra.mrb[8].mxu0 %vm536_vm6, %v582_v54 }
 0x590   :  { %2326 = vmatprep.mubr.msk.bf16.mxu0 %vm2632_vm0, %v2631_v2 }
 0x5e0   :  { %v569_v17 = vpop.xlane.xlu0 %568 }
 0x5e1   :  { %2539 = vrcp.f32 %v569_v17 }
 0x5e4   :  { %v731_v18 = vpop.permute.xlu0 %730  ;;  %v572_v56 = vpop.xlane.xlu1 %571 }
 0x5e5   :  { %v736_v57 = vsel %vm590_vm7, %v731_v18, 0  ;;  %2541 = vrcp.f32 %v572_v56 }
 0x5e6   :  { %2325 = vmatpush3.bf16.msra.mxu0 %v736_v57 }
 0x5e7   :  { %2338 = vmatprep.subr.bf16.mxu0 %v2631_v2 }
 0x5e8   :  { %v683_v58 = vpop.permute.xlu1 %682 }
 0x5e9   :  { %v688_v59 = vsel %vm590_vm7, %v683_v58, 0 }
 0x5ea   :  { %2319 = vmatpush3.bf16.msra.mxu1 %v688_v59 }
 0x5eb   :  { %v2540_v60 = vpop.eup %2539  ;;  %2330 = vmatprep.subr.bf16.mxu1 %v2631_v2 }
 0x5ec   :  { %v579_v61 = vmul.f32 %v2540_v60, %v2532_v40  ;;  %v794_v20 = vpop.permute.xlu1 %793 }
 0x5ee   :  { %v583_v0 = vpack.c.bf16 %v579_v61, %v579_v61 }
 0x5ef   :  { %v2542_v3 = vpop.eup %2541 }
 0x5f0   :  { %v580_v4 = vmul.f32 %v2542_v3, %v2534_v42  ;;  %2321 = vmatmul.mubr.msk.bf16.vlgmr.msra.gmra.mrb[20].mxu1 %vm536_vm6, %v583_v0  ;;  %v796_v21 = vpop.permute.xlu1 %795 }
 0x5f1   :  { %2334 = vmatprep.mubr.msk.bf16.mxu1 %vm2632_vm0, %v2631_v2  ;;  %2331 = vmatpush3.bf16.msra.mxu1 %v794_v20 }
 0x5f2   :  { %v584_v6 = vpack.c.bf16 %v580_v4, %v580_v4  ;;  %2332 = vmatprep.subr.bf16.mxu1 %v2631_v2 }
 0x5f4   :  { %2327 = vmatmul.mubr.msk.bf16.vlgmr.msra.gmra.mrb[12].mxu0 %vm536_vm6, %v584_v6 }
 0x5f5   :  { %2339 = vmatpush3.bf16.msra.mxu0 %v2503_v5  ;;  %2342 = vmatprep.mubr.msk.bf16.mxu0 %vm2632_vm0, %v2631_v2 }
 0x5f6   :  { %2340 = vmatprep.subr.bf16.mxu0 %v2631_v2  ;;  %2333 = vmatpush3.bf16.msra.mxu1 %v796_v21 }
 0x5f7   :  { %2346 = vmatprep.subr.bf16.mxu1 %v2631_v2 }
 0x5f9   :  { %2341 = vmatpush3.bf16.msra.mxu0 %v2506_v7 }
 0x5fa   :  { %2358 = vmatprep.subr.bf16.mxu0 %v2631_v2 }
 0x65e   :  { %v628_v8 = vpop.f32.mrb[16].mxu1 }
 0x65f   :  { %v2310_v9 = vpop.f32.mrb[17].mxu1 }
 0x660   :  { %v631_v10 = vpop.f32.mrb[18].mxu1 }
 0x661   :  { %v2311_v13 = vpop.f32.mrb[19].mxu1 }
 0x662   :  { %v676_v15 = vpop.f32.mrb[8].mxu0 }
 0x663   :  { %v2316_v16 = vpop.f32.mrb[9].mxu0 }
 0x664   :  { %v679_v11 = vpop.f32.mrb[10].mxu0  ;;  %v885_v16 = vsub.s32 3, %v2776_v48 }
 0x665   :  { %v2317_v19 = vpop.f32.mrb[11].mxu0 }
 0x6c3   :  { %v724_v30 = vpop.f32.mrb[20].mxu1 }
 0x6c4   :  { %v2322_v22 = vpop.f32.mrb[21].mxu1 }
 0x6c5   :  { %v727_v23 = vpop.f32.mrb[22].mxu1 }
 0x6c6   :  { %v2323_v31 = vpop.f32.mrb[23].mxu1 }
 0x6c7   :  { %v772_v24 = vpop.f32.mrb[12].mxu0 }
 0x6c8   :  { %v2477_v25 = vpack.i.bf16 %v772_v24, %v724_v30  ;;  %v2328_v26 = vpop.f32.mrb[13].mxu0  ;;  %v886_v30 = vrot.slane %v2801_v1, %v885_v16 }
 0x6c9   :  { %v775_v27 = vpop.f32.mrb[14].mxu0  ;;  %v2508_v26 = vld [vmem:[%s3214_s8 + $0x8] sm:$0xff]  }
 0x6ca   :  { %v2329_v28 = vpop.f32.mrb[15].mxu0  ;;  %2478 = vrot.lane.b32.xlu0 %v2477_v25, %s2639_s14  ;;  %v2507_v25 = vld [vmem:[%s3214_s8] sm:$0xff]   ;;  %v2509_v27 = vld [vmem:[%s3214_s8 + $0x10] sm:$0xff]  }
 0x6cb   :  { %v2510_v28 = vld [vmem:[%s3214_s8 + $0x18] sm:$0xff]  }
 0x73c   :  { %v2479_v12 = vpop.permute.xlu0 %2478 }
 0x73d   :  { %v2481_v29 = vunpack.i.h.bf16 %v2479_v12  ;;  %v2480_v32 = vunpack.i.l.bf16 %v2479_v12  ;;  %v892_v12 = vsub.s32 4, %v2776_v48 }
 0x73f   :  { %v787_v33 = vsel %vm322_vm5, %v676_v15, %v2481_v29  ;;  %v786_v34 = vsel %vm322_vm5, %v628_v8, %v2480_v32  ;;  %v2925_v8 = vsub.s32 2, %v2776_v48  ;;  %v893_v29 = vrot.slane %v2801_v1, %v892_v12 }
 0x740   :  { %v788_v35 = vpack.c.bf16 %v787_v33, %v786_v34 }
 0x741   :  { %v880_v15 = vrot.slane %v2801_v1, %v2925_v8 }
 0x742   :  { %2335 = vmatmul.mubr.msk.bf16.vlgmr.msra.gmra.mrb[24].mxu1 %vm166_vm4, %v788_v35 }
 0x743   :  { %2354 = vmatprep.mubr.msk.bf16.mxu1 %vm2632_vm0, %v2631_v2  ;;  %2347 = vmatpush3.bf16.msra.mxu1 %v2507_v25 }
 0x744   :  { %2348 = vmatprep.subr.bf16.mxu1 %v2631_v2 }
 0x747   :  { %2349 = vmatpush3.bf16.msra.mxu1 %v2508_v26 }
 0x748   :  { %2350 = vmatprep.subr.bf16.mxu1 %v2631_v2 }
 0x74b   :  { %2351 = vmatpush3.bf16.msra.mxu1 %v2509_v27 }
 0x74c   :  { %2352 = vmatprep.subr.bf16.mxu1 %v2631_v2 }
 0x74f   :  { %2353 = vmatpush3.bf16.msra.mxu1 %v2510_v28 }
 0x750   :  { %2372 = vmatprep.subr.bf16.mxu1 %v2631_v2 }
 0x815   :  { %v836_v37 = vpop.f32.mrb[24].mxu1 }
 0x816   :  { %v837_v38 = vadd.f32 %v836_v37, %v792_v36  ;;  %v2336_v40 = vpop.f32.mrb[25].mxu1 }
 0x817   :  { %v839_v41 = vpop.f32.mrb[26].mxu1 }
 0x818   :  { %v843_v42 = vadd.f32 %v837_v38, %v2789_v62  ;;  %v840_v43 = vadd.f32 %v839_v41, %v792_v36  ;;  %v2337_v44 = vpop.f32.mrb[27].mxu1 }
 0x81a   :  { %v844_v45 = vadd.f32 %v840_v43, %v2791_v63  ;;  %v845_v46 = vsel %vm166_vm4, %v843_v42, 0.0  ;;  %v853_v47 = vmul.f32 %v843_v42, %v843_v42 }
 0x81b   :  { %846 = vadd.xlane.f32.xlu0 %v845_v46 }
 0x81c   :  { %v848_v50 = vsel %vm166_vm4, %v844_v45, 0.0  ;;  %v855_v52 = vsel %vm166_vm4, %v853_v47, 0.0  ;;  %v854_v53 = vmul.f32 %v844_v45, %v844_v45 }
 0x81d   :  { %849 = vadd.xlane.f32.xlu1 %v848_v50 }
 0x81e   :  { %v858_v54 = vsel %vm166_vm4, %v854_v53, 0.0 }
 0x81f   :  { %856 = vadd.xlane.f32.xlu0 %v855_v52 }
 0x823   :  { %859 = vadd.xlane.f32.xlu0 %v858_v54 }
 0x8a8   :  { %v847_v17 = vpop.xlane.xlu0 %846 }
 0x8a9   :  { %v851_v62 = vmul.f32 0.03125, %v847_v17 }
 0x8aa   :  { %v850_v18 = vpop.xlane.xlu1 %849 }
 0x8ab   :  { %v863_v57 = vmul.f32 %v851_v62, %v851_v62  ;;  %v852_v63 = vmul.f32 0.03125, %v850_v18  ;;  %v869_v9 = vsub.f32 %v843_v42, %v851_v62 }
 0x8ac   :  { %v857_v56 = vpop.xlane.xlu0 %856 }
 0x8ad   :  { %v861_v58 = vmul.f32 0.03125, %v857_v56  ;;  %v864_v61 = vmul.f32 %v852_v63, %v852_v63  ;;  %v870_v11 = vsub.f32 %v844_v45, %v852_v63 }
 0x8af   :  { %v865_v59 = vsub.f32 %v861_v58, %v863_v57  ;;  %v975_v58 = vsub.s32 5, %v2776_v48 }
 0x8b0   :  { %v860_v60 = vpop.xlane.xlu0 %859 }
 0x8b1   :  { %v867_v0 = vmax.f32 %v865_v59, 0.0  ;;  %v862_v3 = vmul.f32 0.03125, %v860_v60  ;;  %v976_v59 = vrot.slane %v2801_v1, %v975_v58 }
 0x8b3   :  { %v871_v4 = vadd.f32 1e-12, %v867_v0  ;;  %v866_v5 = vsub.f32 %v862_v3, %v864_v61 }
 0x8b5   :  { %2543 = vrsqrt.f32 %v871_v4  ;;  %v868_v6 = vmax.f32 %v866_v5, 0.0 }
 0x8b7   :  { %v872_v7 = vadd.f32 1e-12, %v868_v6 }
 0x8b9   :  { %2545 = vrsqrt.f32 %v872_v7 }
 0x8bf   :  { %v2544_v10 = vpop.eup %2543 }
 0x8c0   :  { %v875_v13 = vmul.f32 %v2544_v10, %v869_v9 }
 0x8c2   :  { %v881_v21 = vmul.f32 %v880_v15, %v875_v13 }
 0x8c3   :  { %v2546_v19 = vpop.eup %2545 }
 0x8c4   :  { %v876_v20 = vmul.f32 %v2546_v19, %v870_v11  ;;  %v887_v23 = vadd.f32 %v886_v30, %v881_v21  ;;  %v2976_v21 = vld [vmem:[%s3213_s7 + $0x30] ss:$8 sps:$4 sm:$0xff]  }
 0x8c6   :  { %v882_v22 = vmul.f32 %v880_v15, %v876_v20  ;;  %v2970_v20 = vld [vmem:[%s3213_s7 + $0x20] ss:$8 sps:$4 sm:$0xff]  }
 0x8c8   :  { %v888_v31 = vadd.f32 %v886_v30, %v882_v22 }
 0x8ca   :  { %v889_v24 = vpack.c.bf16 %v888_v31, %v887_v23 }
 0x8cc   :  { %2343 = vmatmul.mubr.msk.bf16.vlgmr.msra.gmra.mrb[16].mxu0 %vm166_vm4, %v889_v24 }
 0x8cd   :  { %2362 = vmatprep.mubr.msk.bf16.mxu0 %vm2632_vm0, %v2631_v2  ;;  %2359 = vmatpush3.bf16.msra.mxu0 %v2970_v20 }
 0x8ce   :  { %2360 = vmatprep.subr.bf16.mxu0 %v2631_v2 }
 0x8d1   :  { %2361 = vmatpush3.bf16.msra.mxu0 %v2976_v21 }
 0x8d2   :  { %2366 = vmatprep.subr.bf16.mxu0 %v2631_v2 }
 0x99f   :  { %v939_v32 = vpop.f32.mrb[16].mxu0 }
 0x9a0   :  { %v940_v33 = vadd.f32 %v939_v32, %v893_v29  ;;  %v2344_v34 = vpop.f32.mrb[17].mxu0 }
 0x9a1   :  { %v942_v35 = vpop.f32.mrb[18].mxu0 }
 0x9a2   :  { %v946_v36 = vmul.f32 %v940_v33, %v940_v33  ;;  %v943_v37 = vadd.f32 %v942_v35, %v893_v29  ;;  %v2345_v38 = vpop.f32.mrb[19].mxu0 }
 0x9a3   :  { %v1082_v38 = vsub.s32 6, %v2776_v48 }
 0x9a4   :  { %v948_v40 = vmul.f32 %v946_v36, %v940_v33  ;;  %v947_v41 = vmul.f32 %v943_v37, %v943_v37 }
 0x9a6   :  { %v950_v42 = vmul.f32 0.044715, %v948_v40  ;;  %v949_v43 = vmul.f32 %v947_v41, %v943_v37  ;;  %v1083_v41 = vrot.slane %v2801_v1, %v1082_v38 }
 0x9a8   :  { %v952_v44 = vadd.f32 %v950_v42, %v940_v33  ;;  %v951_v45 = vmul.f32 0.044715, %v949_v43  ;;  %v1088_v42 = vsub.s32 7, %v2776_v48 }
 0x9aa   :  { %v954_v46 = vmul.f32 0.7978846, %v952_v44  ;;  %v953_v47 = vadd.f32 %v951_v45, %v943_v37 }
 0x9ac   :  { %2547 = vtanh.f32 %v954_v46  ;;  %v955_v50 = vmul.f32 0.7978846, %v953_v47 }
 0x9ae   :  { %2549 = vtanh.f32 %v955_v50 }
 0x9b6   :  { %v2548_v52 = vpop.eup %2547 }
 0x9b7   :  { %v958_v53 = vadd.f32 1.0, %v2548_v52  ;;  %v1089_v52 = vrot.slane %v2801_v1, %v1088_v42 }
 0x9b8   :  { %v2550_v54 = vpop.eup %2549 }
 0x9b9   :  { %v960_v17 = vmul.f32 0.5, %v958_v53  ;;  %v959_v62 = vadd.f32 1.0, %v2550_v54 }
 0x9bb   :  { %v961_v18 = vmul.f32 0.5, %v959_v62  ;;  %v962_v56 = vmul.f32 %v960_v17, %v940_v33 }
 0x9bd   :  { %v963_v57 = vmul.f32 %v961_v18, %v943_v37  ;;  %v3001_v18 = vld [vmem:[%s3212_s6 + $0x8] sm:$0xff] }
 0x9be   :  { %v1103_v1 = vrot.slane %v3001_v18, %v2779_v49 }
 0x9bf   :  { %v964_v63 = vpack.c.bf16 %v963_v57, %v962_v56 }
 0x9c1   :  { %2355 = vmatmul.mubr.msk.bf16.vlgmr.msra.gmra.mrb[28].mxu1 %vm1001_vm8, %v964_v63 }
 0x9c2   :  { %2374 = vmatprep.mubr.msk.bf16.mxu1 %vm2632_vm0, %v2631_v2 }
 0xa94   :  { %v1039_v60 = vpop.f32.mrb[28].mxu1 }
 0xa95   :  { %v1040_v61 = vadd.f32 %v1039_v60, %v976_v59  ;;  %v2356_v0 = vpop.f32.mrb[29].mxu1 }
 0xa96   :  { %v1042_v3 = vpop.f32.mrb[30].mxu1 }
 0xa97   :  { %v1046_v4 = vadd.f32 %v1040_v61, %v887_v23  ;;  %v1043_v5 = vadd.f32 %v1042_v3, %v976_v59  ;;  %v2357_v6 = vpop.f32.mrb[31].mxu1 }
 0xa99   :  { %v1047_v7 = vadd.f32 %v1043_v5, %v888_v31  ;;  %v1048_v9 = vsel %vm166_vm4, %v1046_v4, 0.0  ;;  %v1056_v10 = vmul.f32 %v1046_v4, %v1046_v4 }
 0xa9a   :  { %1049 = vadd.xlane.f32.xlu1 %v1048_v9 }
 0xa9b   :  { %v1051_v13 = vsel %vm166_vm4, %v1047_v7, 0.0  ;;  %v1057_v15 = vmul.f32 %v1047_v7, %v1047_v7  ;;  %v1058_v11 = vsel %vm166_vm4, %v1056_v10, 0.0 }
 0xa9c   :  { %1052 = vadd.xlane.f32.xlu0 %v1051_v13 }
 0xa9d   :  { %v1061_v19 = vsel %vm166_vm4, %v1057_v15, 0.0 }
 0xa9e   :  { %1059 = vadd.xlane.f32.xlu1 %v1058_v11 }
 0xaa0   :  { %1062 = vadd.xlane.f32.xlu0 %v1061_v19 }
 0xb27   :  { %v1050_v30 = vpop.xlane.xlu1 %1049 }
 0xb28   :  { %v1054_v22 = vmul.f32 0.03125, %v1050_v30 }
 0xb29   :  { %v1053_v23 = vpop.xlane.xlu0 %1052 }
 0xb2a   :  { %v1055_v31 = vmul.f32 0.03125, %v1053_v23  ;;  %v1066_v25 = vmul.f32 %v1054_v22, %v1054_v22  ;;  %v1072_v40 = vsub.f32 %v1046_v4, %v1054_v22 }
 0xb2b   :  { %v1060_v24 = vpop.xlane.xlu1 %1059 }
 0xb2c   :  { %v1064_v26 = vmul.f32 0.03125, %v1060_v24  ;;  %v1067_v28 = vmul.f32 %v1055_v31, %v1055_v31  ;;  %v1073_v44 = vsub.f32 %v1047_v7, %v1055_v31 }
 0xb2d   :  { %v1063_v27 = vpop.xlane.xlu0 %1062 }
 0xb2e   :  { %v1068_v29 = vsub.f32 %v1064_v26, %v1066_v25  ;;  %v1065_v32 = vmul.f32 0.03125, %v1063_v27 }
 0xb30   :  { %v1070_v33 = vmax.f32 %v1068_v29, 0.0  ;;  %v1069_v34 = vsub.f32 %v1065_v32, %v1067_v28 }
 0xb32   :  { %v1074_v35 = vadd.f32 1e-12, %v1070_v33  ;;  %v1071_v36 = vmax.f32 %v1069_v34, 0.0 }
 0xb34   :  { %2551 = vrsqrt.f32 %v1074_v35  ;;  %v1075_v37 = vadd.f32 1e-12, %v1071_v36 }
 0xb36   :  { %2553 = vrsqrt.f32 %v1075_v37 }
 0xb3e   :  { %v2552_v43 = vpop.eup %2551 }
 0xb3f   :  { %v1078_v45 = vmul.f32 %v2552_v43, %v1072_v40 }
 0xb40   :  { %v2554_v46 = vpop.eup %2553 }
 0xb41   :  { %v1079_v47 = vmul.f32 %v2554_v46, %v1073_v44  ;;  %v1084_v50 = vmul.f32 %v1083_v41, %v1078_v45 }
 0xb43   :  { %v1085_v53 = vmul.f32 %v1083_v41, %v1079_v47  ;;  %v2989_v54 = vadd.f32 %v1089_v52, %v1084_v50 }
 0xb45   :  { %v2991_v17 = vadd.f32 %v1089_v52, %v1085_v53 }
 0xb47   :  { %v1099_v62 = vpack.c.bf16 %v2991_v17, %v2989_v54 }
 0xb49   :  { %2363 = vmatmul.mubr.msk.bf16.vlgmr.msra.gmra.mrb[20].mxu0 %vm166_vm4, %v1099_v62 }
 0xb4a   :  { %2368 = vmatprep.mubr.msk.bf16.mxu0 %vm2632_vm0, %v2631_v2 }
 0xc1c   :  { %v1153_v56 = vpop.f32.mrb[20].mxu0 }
 0xc1d   :  { %v1154_v57 = vadd.f32 %v1153_v56, %v1103_v1  ;;  %v2364_v63 = vpop.f32.mrb[21].mxu0 }
 0xc1e   :  { %v1156_v59 = vpop.f32.mrb[22].mxu0 }
 0xc1f   :  { %v3005_v60 = vpack.c.bf16 %v1154_v57, %v1154_v57  ;;  %v1157_v61 = vadd.f32 %v1156_v59, %v1103_v1  ;;  %v2365_v0 = vpop.f32.mrb[23].mxu0 }
 0xc21   :  { %v2482_v3 = vpack.i.bf16 %v1157_v61, %v1154_v57  ;;  %1173 = vrot.lane.b32.xlu0 %v3005_v60, %s2635_s26  ;;  %v3010_v4 = vpack.c.bf16 %v1157_v61, %v1157_v61 }
 0xc23   :  { %2483 = vrot.lane.b32.xlu1 %v2482_v3, %s2634_s25 }
 0xc27   :  { %1222 = vrot.lane.b32.xlu1 %v3010_v4, %s2635_s26 }
 0xc93   :  { %v1174_v49 = vpop.permute.xlu0 %1173 }
 0xc94   :  { %v1179_v5 = vsel %vm322_vm5, %v1174_v49, 0 }
 0xc95   :  { %2367 = vmatpush3.bf16.xpose.msra.mxu0 %v1179_v5  ;;  %v2484_v6 = vpop.permute.xlu1 %2483 }
 0xc96   :  { %v2486_v7 = vunpack.i.h.bf16 %v2484_v6  ;;  %v2485_v9 = vunpack.i.l.bf16 %v2484_v6  ;;  %2378 = vmatprep.subr.bf16.mxu0 %v2631_v2 }
 0xc98   :  { %v3016_v10 = vpack.c.bf16 %v2486_v7, %v2486_v7  ;;  %v3018_v13 = vpack.c.bf16 %v2485_v9, %v2485_v9 }
 0xc99   :  { %v1223_v15 = vpop.permute.xlu1 %1222 }
 0xc9a   :  { %v1228_v11 = vsel %vm322_vm5, %v1223_v15, 0  ;;  %1320 = vrot.lane.b32.xlu0 %v3016_v10, %s2635_s26  ;;  %1271 = vrot.lane.b32.xlu1 %v3018_v13, %s2635_s26 }
 0xc9b   :  { %2373 = vmatpush3.bf16.xpose.msra.mxu1 %v1228_v11 }
 0xc9c   :  { %2369 = vmatmul.mubr.msk.bf16.vlgmr.msra.gmra.mrb[24].mxu0 %vm322_vm5, %v3005_v60  ;;  %2384 = vmatprep.subr.bf16.mxu1 %v2631_v2 }
 0xc9d   :  { %2380 = vmatprep.mubr.msk.bf16.mxu0 %vm2632_vm0, %v2631_v2 }
 0xca2   :  { %2375 = vmatmul.mubr.msk.bf16.vlgmr.msra.gmra.mrb[32].mxu1 %vm322_vm5, %v3010_v4 }
 0xca3   :  { %2386 = vmatprep.mubr.msk.bf16.mxu1 %vm2632_vm0, %v2631_v2 }
 0xd0c   :  { %v1321_v19 = vpop.permute.xlu0 %1320  ;;  %v1272_v30 = vpop.permute.xlu1 %1271 }
 0xd0d   :  { %v1326_v22 = vsel %vm322_vm5, %v1321_v19, 0  ;;  %v1277_v23 = vsel %vm322_vm5, %v1272_v30, 0 }
 0xd0e   :  { %2379 = vmatpush3.bf16.xpose.msra.mxu0 %v1277_v23  ;;  %2385 = vmatpush3.bf16.xpose.msra.mxu1 %v1326_v22 }
 0xd0f   :  { %2390 = vmatprep.subr.bf16.mxu0 %v2631_v2  ;;  %2396 = vmatprep.subr.bf16.mxu1 %v2631_v2 }
 0xd15   :  { %2381 = vmatmul.mubr.msk.bf16.vlgmr.msra.gmra.mrb[28].mxu0 %vm322_vm5, %v3018_v13  ;;  %2387 = vmatmul.mubr.msk.bf16.vlgmr.msra.gmra.mrb[36].mxu1 %vm322_vm5, %v3016_v10 }
 0xd16   :  { %2392 = vmatprep.mubr.msk.bf16.mxu0 %vm2632_vm0, %v2631_v2  ;;  %2398 = vmatprep.mubr.msk.bf16.mxu1 %vm2632_vm0, %v2631_v2 }
 0xd6f   :  { %v1215_v31 = vpop.f32.mrb[24].mxu0 }
 0xd70   :  { %v1368_v24 = vmul.f32 0.25, %v1215_v31  ;;  %v2370_v25 = vpop.f32.mrb[25].mxu0 }
 0xd71   :  { %v1218_v26 = vpop.f32.mrb[26].mxu0 }
 0xd72   :  { %v2371_v27 = vpop.f32.mrb[27].mxu0  ;;  %v1372_v28 = vadd.f32 %v1368_v24, %v2851_v39 }
 0xd74   :  { %v1376_v29 = vsel %vm536_vm6, %v1372_v28, -inf }
 0xd75   :  { %1377 = vmax.xlane.f32.xlu1 %v1376_v29  ;;  %v1264_v32 = vpop.f32.mrb[32].mxu1 }
 0xd76   :  { %v1369_v33 = vmul.f32 0.25, %v1264_v32  ;;  %v2376_v34 = vpop.f32.mrb[33].mxu1 }
 0xd77   :  { %v1267_v35 = vpop.f32.mrb[34].mxu1 }
 0xd78   :  { %v2377_v36 = vpop.f32.mrb[35].mxu1  ;;  %v1373_v37 = vadd.f32 %v1369_v33, %v2856_v51 }
 0xd7a   :  { %v1379_v40 = vsel %vm536_vm6, %v1373_v37, -inf }
 0xd7b   :  { %1380 = vmax.xlane.f32.xlu0 %v1379_v40 }
 0xde8   :  { %v1313_v41 = vpop.f32.mrb[28].mxu0  ;;  %v1362_v43 = vpop.f32.mrb[36].mxu1 }
 0xde9   :  { %v1370_v44 = vmul.f32 0.25, %v1313_v41  ;;  %v1371_v45 = vmul.f32 0.25, %v1362_v43  ;;  %v2382_v46 = vpop.f32.mrb[29].mxu0  ;;  %v2388_v47 = vpop.f32.mrb[37].mxu1 }
 0xdea   :  { %v1316_v50 = vpop.f32.mrb[30].mxu0  ;;  %v1365_v52 = vpop.f32.mrb[38].mxu1 }
 0xdeb   :  { %v2383_v53 = vpop.f32.mrb[31].mxu0  ;;  %v2389_v62 = vpop.f32.mrb[39].mxu1  ;;  %v1374_v1 = vadd.f32 %v1370_v44, %v2851_v39  ;;  %v1375_v56 = vadd.f32 %v1371_v45, %v2856_v51 }
 0xded   :  { %v1382_v57 = vsel %vm536_vm6, %v1374_v1, -inf  ;;  %v1385_v63 = vsel %vm536_vm6, %v1375_v56, -inf }
 0xdee   :  { %1383 = vmax.xlane.f32.xlu0 %v1382_v57  ;;  %1386 = vmax.xlane.f32.xlu1 %v1385_v63 }
 0xdff   :  { %1472 = vrot.lane.b32.xlu1 %v3010_v4, %s2637_s2 }
 0xe02   :  { %v1378_v59 = vpop.xlane.xlu1 %1377 }
 0xe03   :  { %v1388_v0 = vsub.f32 %v1372_v28, %v1378_v59 }
 0xe04   :  { %1424 = vrot.lane.b32.xlu0 %v3005_v60, %s2637_s2 }
 0xe05   :  { %v1392_v49 = vmul.f32 1.442695, %v1388_v0 }
 0xe07   :  { %2555 = vpow2.f32 %v1392_v49 }
 0xe08   :  { %v1381_v61 = vpop.xlane.xlu0 %1380 }
 0xe09   :  { %v1389_v3 = vsub.f32 %v1373_v37, %v1381_v61 }
 0xe0b   :  { %v1394_v39 = vmul.f32 1.442695, %v1389_v3 }
 0xe0d   :  { %2557 = vpow2.f32 %v1394_v39 }
 0xe11   :  { %v2556_v51 = vpop.eup %2555 }
 0xe12   :  { %v1400_v6 = vsel %vm536_vm6, %v2556_v51, 0.0 }
 0xe17   :  { %v2558_v5 = vpop.eup %2557 }
 0xe18   :  { %v1403_v7 = vsel %vm536_vm6, %v2558_v5, 0.0 }
 0xe23   :  { %1401 = vadd.xlane.f32.xlu0 %v1400_v6  ;;  %1404 = vadd.xlane.f32.xlu1 %v1403_v7 }
 0xe7b   :  { %v1384_v4 = vpop.xlane.xlu0 %1383  ;;  %v1387_v9 = vpop.xlane.xlu1 %1386 }
 0xe7c   :  { %v1390_v15 = vsub.f32 %v1374_v1, %v1384_v4  ;;  %v1391_v60 = vsub.f32 %v1375_v56, %v1387_v9 }
 0xe7e   :  { %v1396_v11 = vmul.f32 1.442695, %v1390_v15  ;;  %v1398_v19 = vmul.f32 1.442695, %v1391_v60 }
 0xe7f   :  { %v1425_v30 = vpop.permute.xlu0 %1424  ;;  %v1473_v22 = vpop.permute.xlu1 %1472 }
 0xe80   :  { %2559 = vpow2.f32 %v1396_v11  ;;  %v1430_v23 = vsel %vm590_vm7, %v1425_v30, 0  ;;  %v1478_v31 = vsel %vm590_vm7, %v1473_v22, 0 }
 0xe81   :  { %2561 = vpow2.f32 %v1398_v19  ;;  %2391 = vmatpush3.bf16.msra.mxu0 %v1430_v23  ;;  %2397 = vmatpush3.bf16.msra.mxu1 %v1478_v31  ;;  %v1630_v23 = vrot.slane %v3001_v18, %v2786_v55 }
 0xe82   :  { %2402 = vmatprep.subr.bf16.mxu0 %v2631_v2  ;;  %2408 = vmatprep.subr.bf16.mxu1 %v2631_v2 }
 0xe8a   :  { %v2560_v24 = vpop.eup %2559 }
 0xe8b   :  { %v2562_v25 = vpop.eup %2561  ;;  %v1406_v26 = vsel %vm536_vm6, %v2560_v24, 0.0 }
 0xe8c   :  { %1407 = vadd.xlane.f32.xlu0 %v1406_v26  ;;  %v1409_v27 = vsel %vm536_vm6, %v2562_v25, 0.0 }
 0xe8d   :  { %1410 = vadd.xlane.f32.xlu1 %v1409_v27 }
 0xe9e   :  { %1520 = vrot.lane.b32.xlu1 %v3018_v13, %s2637_s2 }
 0xea2   :  { %1568 = vrot.lane.b32.xlu0 %v3016_v10, %s2637_s2  ;;  %1631 = vrot.lane.b32.xlu1 %v2970_v20, %s2638_s13 }
 0xea6   :  { %1633 = vrot.lane.b32.xlu1 %v2976_v21, %s2638_s13 }
 0xeb0   :  { %v1402_v28 = vpop.xlane.xlu0 %1401  ;;  %v1405_v29 = vpop.xlane.xlu1 %1404 }
 0xeb1   :  { %2563 = vrcp.f32 %v1402_v28 }
 0xeb2   :  { %2565 = vrcp.f32 %v1405_v29 }
 0xebb   :  { %v2564_v32 = vpop.eup %2563 }
 0xebc   :  { %v2566_v33 = vpop.eup %2565  ;;  %v1416_v34 = vmul.f32 %v2564_v32, %v2556_v51 }
 0xebd   :  { %v1417_v35 = vmul.f32 %v2566_v33, %v2558_v5 }
 0xebe   :  { %v1420_v36 = vpack.c.bf16 %v1416_v34, %v1416_v34 }
 0xebf   :  { %v1421_v37 = vpack.c.bf16 %v1417_v35, %v1417_v35 }
 0xec0   :  { %2393 = vmatmul.mubr.msk.bf16.vlgmr.msra.gmra.mrb[32].mxu0 %vm536_vm6, %v1420_v36 }
 0xec1   :  { %2399 = vmatmul.mubr.msk.bf16.vlgmr.msra.gmra.mrb[40].mxu1 %vm536_vm6, %v1421_v37  ;;  %2404 = vmatprep.mubr.msk.bf16.mxu0 %vm2632_vm0, %v2631_v2 }
 0xec2   :  { %2410 = vmatprep.mubr.msk.bf16.mxu1 %vm2632_vm0, %v2631_v2 }
 0xf19   :  { %v1408_v20 = vpop.xlane.xlu0 %1407 }
 0xf1a   :  { %2567 = vrcp.f32 %v1408_v20  ;;  %v1411_v21 = vpop.xlane.xlu1 %1410 }
 0xf1b   :  { %2569 = vrcp.f32 %v1411_v21 }
 0xf1d   :  { %v1569_v10 = vpop.permute.xlu0 %1568 }
 0xf1e   :  { %v1574_v13 = vsel %vm590_vm7, %v1569_v10, 0  ;;  %v1521_v40 = vpop.permute.xlu1 %1520 }
 0xf1f   :  { %v1526_v41 = vsel %vm590_vm7, %v1521_v40, 0  ;;  %2409 = vmatpush3.bf16.msra.mxu1 %v1574_v13 }
 0xf20   :  { %2403 = vmatpush3.bf16.msra.mxu0 %v1526_v41  ;;  %2422 = vmatprep.subr.bf16.mxu1 %v2631_v2 }
 0xf21   :  { %2414 = vmatprep.subr.bf16.mxu0 %v2631_v2 }
 0xf22   :  { %v1632_v52 = vpop.permute.xlu1 %1631 }
 0xf24   :  { %v2568_v43 = vpop.eup %2567 }
 0xf25   :  { %v2570_v44 = vpop.eup %2569  ;;  %v1418_v45 = vmul.f32 %v2568_v43, %v2560_v24 }
 0xf26   :  { %v1419_v46 = vmul.f32 %v2570_v44, %v2562_v25  ;;  %v1634_v0 = vpop.permute.xlu1 %1633 }
 0xf27   :  { %v1422_v47 = vpack.c.bf16 %v1418_v45, %v1418_v45 }
 0xf28   :  { %v1423_v50 = vpack.c.bf16 %v1419_v46, %v1419_v46 }
 0xf29   :  { %2405 = vmatmul.mubr.msk.bf16.vlgmr.msra.gmra.mrb[36].mxu0 %vm536_vm6, %v1422_v47 }
 0xf2a   :  { %2411 = vmatmul.mubr.msk.bf16.vlgmr.msra.gmra.mrb[44].mxu1 %vm536_vm6, %v1423_v50  ;;  %2418 = vmatprep.mubr.msk.bf16.mxu0 %vm2632_vm0, %v2631_v2 }
 0xf2b   :  { %2426 = vmatprep.mubr.msk.bf16.mxu1 %vm2632_vm0, %v2631_v2  ;;  %2415 = vmatpush3.bf16.msra.mxu0 %v1632_v52 }
 0xf2c   :  { %2416 = vmatprep.subr.bf16.mxu0 %v2631_v2 }
 0xf2f   :  { %2417 = vmatpush3.bf16.msra.mxu0 %v1634_v0 }
 0xf30   :  { %2430 = vmatprep.subr.bf16.mxu0 %v2631_v2 }
 0xf93   :  { %v1466_v53 = vpop.f32.mrb[32].mxu0 }
 0xf94   :  { %v1514_v62 = vpop.f32.mrb[40].mxu1  ;;  %v2394_v1 = vpop.f32.mrb[33].mxu0 }
 0xf95   :  { %v2400_v56 = vpop.f32.mrb[41].mxu1  ;;  %v1469_v57 = vpop.f32.mrb[34].mxu0 }
 0xf96   :  { %v1517_v63 = vpop.f32.mrb[42].mxu1  ;;  %v2395_v59 = vpop.f32.mrb[35].mxu0 }
 0xf97   :  { %v2401_v61 = vpop.f32.mrb[43].mxu1  ;;  %v1718_v59 = vrot.slane %v3001_v18, %v2925_v8 }
 0xffc   :  { %v1562_v3 = vpop.f32.mrb[36].mxu0 }
 0xffd   :  { %v1610_v49 = vpop.f32.mrb[44].mxu1  ;;  %v2406_v39 = vpop.f32.mrb[37].mxu0 }
 0xffe   :  { %v2487_v51 = vpack.i.bf16 %v1610_v49, %v1562_v3  ;;  %v2412_v5 = vpop.f32.mrb[45].mxu1  ;;  %v1565_v6 = vpop.f32.mrb[38].mxu0  ;;  %v1724_v39 = vrot.slane %v3001_v18, %v885_v16  ;;  %v2518_v16 = vld [vmem:[%s3214_s8 + $0x28] sm:$0xff]  }
 0xfff   :  { %v1613_v7 = vpop.f32.mrb[46].mxu1  ;;  %v2407_v4 = vpop.f32.mrb[39].mxu0 }
0x1000   :  { %2488 = vrot.lane.b32.xlu0 %v2487_v51, %s2639_s14  ;;  %v2413_v9 = vpop.f32.mrb[47].mxu1  ;;  %v2517_v4 = vld [vmem:[%s3214_s8 + $0x20] sm:$0xff]  }
0x1001   :  { %v2519_v9 = vld [vmem:[%s3214_s8 + $0x30] sm:$0xff]  }
0x1072   :  { %v2489_v15 = vpop.permute.xlu0 %2488 }
0x1073   :  { %v2491_v60 = vunpack.i.h.bf16 %v2489_v15  ;;  %v2490_v11 = vunpack.i.l.bf16 %v2489_v15  ;;  %v2520_v15 = vld [vmem:[%s3214_s8 + $0x38] sm:$0xff]  }
0x1075   :  { %v1625_v19 = vsel %vm322_vm5, %v1514_v62, %v2491_v60  ;;  %v1624_v30 = vsel %vm322_vm5, %v1466_v53, %v2490_v11  ;;  %v1731_v60 = vrot.slane %v3001_v18, %v892_v12 }
0x1076   :  { %v1626_v22 = vpack.c.bf16 %v1625_v19, %v1624_v30 }
0x1078   :  { %2419 = vmatmul.mubr.msk.bf16.vlgmr.msra.gmra.mrb[40].mxu0 %vm166_vm4, %v1626_v22 }
0x1079   :  { %2438 = vmatprep.mubr.msk.bf16.mxu0 %vm2632_vm0, %v2631_v2  ;;  %2431 = vmatpush3.bf16.msra.mxu0 %v2517_v4 }
0x107a   :  { %2432 = vmatprep.subr.bf16.mxu0 %v2631_v2 }
0x107d   :  { %2433 = vmatpush3.bf16.msra.mxu0 %v2518_v16 }
0x107e   :  { %2434 = vmatprep.subr.bf16.mxu0 %v2631_v2 }
0x1081   :  { %2435 = vmatpush3.bf16.msra.mxu0 %v2519_v9 }
0x1082   :  { %2436 = vmatprep.subr.bf16.mxu0 %v2631_v2 }
0x1085   :  { %2437 = vmatpush3.bf16.msra.mxu0 %v2520_v15 }
0x114b   :  { %v1674_v31 = vpop.f32.mrb[40].mxu0 }
0x114c   :  { %v1675_v24 = vadd.f32 %v1674_v31, %v1630_v23  ;;  %v2420_v25 = vpop.f32.mrb[41].mxu0 }
0x114d   :  { %v1677_v26 = vpop.f32.mrb[42].mxu0 }
0x114e   :  { %v1681_v27 = vadd.f32 %v1675_v24, %v2989_v54  ;;  %v1678_v28 = vadd.f32 %v1677_v26, %v1630_v23  ;;  %v2421_v29 = vpop.f32.mrb[43].mxu0  ;;  %v2515_v54 = vld [vmem:[%s3213_s7 + $0x24] ss:$8 sps:$4 sm:$0xff]  }
0x114f   :  { %2423 = vmatpush3.bf16.msra.mxu1 %v2515_v54 }
0x1150   :  { %v1682_v32 = vadd.f32 %v1678_v28, %v2991_v17  ;;  %v1683_v33 = vsel %vm166_vm4, %v1681_v27, 0.0  ;;  %v1691_v34 = vmul.f32 %v1681_v27, %v1681_v27  ;;  %v2516_v17 = vld [vmem:[%s3213_s7 + $0x34] ss:$8 sps:$4 sm:$0xff]   ;;  %2424 = vmatprep.subr.bf16.mxu1 %v2631_v2 }
0x1151   :  { %1684 = vadd.xlane.f32.xlu0 %v1683_v33 }
0x1152   :  { %v1686_v35 = vsel %vm166_vm4, %v1682_v32, 0.0  ;;  %v1693_v36 = vsel %vm166_vm4, %v1691_v34, 0.0  ;;  %v1692_v55 = vmul.f32 %v1682_v32, %v1682_v32 }
0x1153   :  { %1687 = vadd.xlane.f32.xlu1 %v1686_v35  ;;  %2425 = vmatpush3.bf16.msra.mxu1 %v2516_v17 }
0x1154   :  { %v1696_v37 = vsel %vm166_vm4, %v1692_v55, 0.0  ;;  %2442 = vmatprep.subr.bf16.mxu1 %v2631_v2 }
0x1155   :  { %1694 = vadd.xlane.f32.xlu0 %v1693_v36 }
0x1159   :  { %1697 = vadd.xlane.f32.xlu0 %v1696_v37 }
0x11de   :  { %v1685_v20 = vpop.xlane.xlu0 %1684 }
0x11df   :  { %v1689_v21 = vmul.f32 0.03125, %v1685_v20 }
0x11e0   :  { %v1688_v10 = vpop.xlane.xlu1 %1687 }
0x11e1   :  { %v1701_v40 = vmul.f32 %v1689_v21, %v1689_v21  ;;  %v1690_v41 = vmul.f32 0.03125, %v1688_v10  ;;  %v1707_v56 = vsub.f32 %v1681_v27, %v1689_v21 }
0x11e2   :  { %v1695_v13 = vpop.xlane.xlu0 %1694 }
0x11e3   :  { %v1699_v43 = vmul.f32 0.03125, %v1695_v13  ;;  %v1702_v46 = vmul.f32 %v1690_v41, %v1690_v41  ;;  %v1708_v61 = vsub.f32 %v1682_v32, %v1690_v41  ;;  %v1815_v13 = vrot.slane %v3001_v18, %v975_v58 }
0x11e5   :  { %v1703_v44 = vsub.f32 %v1699_v43, %v1701_v40 }
0x11e6   :  { %v1698_v45 = vpop.xlane.xlu0 %1697 }
0x11e7   :  { %v1705_v47 = vmax.f32 %v1703_v44, 0.0  ;;  %v1700_v50 = vmul.f32 0.03125, %v1698_v45 }
0x11e9   :  { %v1709_v52 = vadd.f32 1e-12, %v1705_v47  ;;  %v1704_v53 = vsub.f32 %v1700_v50, %v1702_v46 }
0x11eb   :  { %2571 = vrsqrt.f32 %v1709_v52  ;;  %v1706_v62 = vmax.f32 %v1704_v53, 0.0 }
0x11ed   :  { %v1710_v1 = vadd.f32 1e-12, %v1706_v62 }
0x11ef   :  { %2573 = vrsqrt.f32 %v1710_v1 }
0x11f5   :  { %v2572_v57 = vpop.eup %2571 }
0x11f6   :  { %v1713_v63 = vmul.f32 %v2572_v57, %v1707_v56  ;;  %v2521_v57 = vld [vmem:[%s3215_s9] sm:$0xff]  }
0x11f8   :  { %v1719_v49 = vmul.f32 %v1718_v59, %v1713_v63  ;;  %v2522_v63 = vld [vmem:[%s3215_s9 + $0x8] sm:$0xff]  }
0x11f9   :  { %v2574_v0 = vpop.eup %2573 }
0x11fa   :  { %v1714_v3 = vmul.f32 %v2574_v0, %v1708_v61  ;;  %v1725_v5 = vadd.f32 %v1724_v39, %v1719_v49 }
0x11fc   :  { %v1720_v51 = vmul.f32 %v1718_v59, %v1714_v3 }
0x11fe   :  { %v1726_v6 = vadd.f32 %v1724_v39, %v1720_v51 }
0x1200   :  { %v1727_v7 = vpack.c.bf16 %v1726_v6, %v1725_v5 }
0x1202   :  { %2427 = vmatmul.mubr.msk.bf16.vlgmr.msra.gmra.mrb[48].mxu1 %vm166_vm4, %v1727_v7 }
0x1203   :  { %2446 = vmatprep.mubr.msk.bf16.mxu1 %vm2632_vm0, %v2631_v2  ;;  %2443 = vmatpush3.bf16.msra.mxu1 %v2521_v57 }
0x1204   :  { %2444 = vmatprep.subr.bf16.mxu1 %v2631_v2 }
0x1207   :  { %2445 = vmatpush3.bf16.msra.mxu1 %v2522_v63 }
0x12d5   :  { %v1777_v11 = vpop.f32.mrb[48].mxu1 }
0x12d6   :  { %v1778_v19 = vadd.f32 %v1777_v11, %v1731_v60  ;;  %v2428_v30 = vpop.f32.mrb[49].mxu1 }
0x12d7   :  { %v1780_v22 = vpop.f32.mrb[50].mxu1  ;;  %v1921_v30 = vrot.slane %v3001_v18, %v1082_v38  ;;  %v2593_v38 = vld [vmem:[%s3211_s5] sm:$0x7] }
0x12d8   :  { %v1784_v23 = vmul.f32 %v1778_v19, %v1778_v19  ;;  %v1781_v31 = vadd.f32 %v1780_v22, %v1731_v60  ;;  %v2429_v24 = vpop.f32.mrb[51].mxu1 }
0x12da   :  { %v1786_v25 = vmul.f32 %v1784_v23, %v1778_v19  ;;  %v1785_v26 = vmul.f32 %v1781_v31, %v1781_v31 }
0x12dc   :  { %v1788_v27 = vmul.f32 0.044715, %v1786_v25  ;;  %v1787_v28 = vmul.f32 %v1785_v26, %v1781_v31 }
0x12de   :  { %v1790_v29 = vadd.f32 %v1788_v27, %v1778_v19  ;;  %v1789_v32 = vmul.f32 0.044715, %v1787_v28  ;;  %v1927_v27 = vrot.slane %v3001_v18, %v1088_v42 }
0x12e0   :  { %v1792_v33 = vmul.f32 0.7978846, %v1790_v29  ;;  %v1791_v34 = vadd.f32 %v1789_v32, %v1781_v31 }
0x12e2   :  { %2575 = vtanh.f32 %v1792_v33  ;;  %v1793_v35 = vmul.f32 0.7978846, %v1791_v34  ;;  %v1938_v34 = vrot.slane %v2593_v38, %v2925_v8 }
0x12e4   :  { %2577 = vtanh.f32 %v1793_v35 }
0x12ec   :  { %v2576_v36 = vpop.eup %2575 }
0x12ed   :  { %v1796_v12 = vadd.f32 1.0, %v2576_v36 }
0x12ee   :  { %v2578_v55 = vpop.eup %2577 }
0x12ef   :  { %v1798_v37 = vmul.f32 0.5, %v1796_v12  ;;  %v1797_v54 = vadd.f32 1.0, %v2578_v55 }
0x12f1   :  { %v1799_v17 = vmul.f32 0.5, %v1797_v54  ;;  %v1800_v20 = vmul.f32 %v1798_v37, %v1778_v19 }
0x12f3   :  { %v1801_v21 = vmul.f32 %v1799_v17, %v1781_v31 }
0x12f5   :  { %v1802_v10 = vpack.c.bf16 %v1801_v21, %v1800_v20 }
0x12f7   :  { %2439 = vmatmul.mubr.msk.bf16.vlgmr.msra.gmra.mrb[44].mxu0 %vm1001_vm8, %v1802_v10 }
0x13ca   :  { %v1877_v40 = vpop.f32.mrb[44].mxu0 }
0x13cb   :  { %v1878_v41 = vadd.f32 %v1877_v40, %v1815_v13  ;;  %v2440_v43 = vpop.f32.mrb[45].mxu0 }
0x13cc   :  { %v1880_v44 = vpop.f32.mrb[46].mxu0 }
0x13cd   :  { %v1884_v45 = vadd.f32 %v1878_v41, %v1725_v5  ;;  %v1881_v46 = vadd.f32 %v1880_v44, %v1815_v13  ;;  %v2441_v47 = vpop.f32.mrb[47].mxu0  ;;  %v2017_v13 = vld [vmem:[%s3207_s1] sm:$0xff]  ;;  %v2018_v41 = vld [vmem:[%s3207_s1 + $0x8] sm:$0xff]  ;;  %s2640_s1 = smov [#allocation2]  }
0x13ce   :  { %vm2019_vm9 = vcmp.ge.s32.totalorder %v2017_v13, 0  ;;  %vm2020_vm10 = vcmp.ge.s32.totalorder %v2018_v41, 0  ;;  %s2086_s21 = sshll.u32 %s2640_s1, 4  ;;  %s2087_s21 = int_to_ptr.vmem [resolvable:$true] %s2086_s21 }
0x13cf   :  { %v1885_v50 = vadd.f32 %v1881_v46, %v1726_v6  ;;  %v1886_v52 = vsel %vm166_vm4, %v1884_v45, 0.0  ;;  %v1894_v53 = vmul.f32 %v1884_v45, %v1884_v45  ;;  %v2025_v40 = vsel %vm2019_vm9, %v2017_v13, 0  ;;  %s2594_s22 = scalar_lea.vmem %s2087_s21, 256  ;;  %p2599_p1 = scmp.lt.s32.totalorder %s2087_s21, %s2087_s21 }
0x13d0   :  { %1887 = vadd.xlane.f32.xlu1 %v1886_v52  ;;  %v2026_v43 = vsel %vm2020_vm10, %v2018_v41, 0  ;;  %p2595_p0 = scmp.ne.s32.totalorder %s2087_s21, %s2594_s22  ;;  %p2600_p2 = scmp.lt.s32.totalorder %s2594_s22, %s2594_s22 }
0x13d1   :  { %v1889_v62 = vsel %vm166_vm4, %v1885_v50, 0.0  ;;  %v1895_v1 = vmul.f32 %v1885_v50, %v1885_v50  ;;  %v1896_v56 = vsel %vm166_vm4, %v1894_v53, 0.0 }
0x13d2   :  { %1890 = vadd.xlane.f32.xlu0 %v1889_v62  ;;  %p2601_p3 = por %p2600_p2, %p2599_p1 }
0x13d3   :  { %v1899_v58 = vsel %vm166_vm4, %v1895_v1, 0.0 }
0x13d4   :  { %1897 = vadd.xlane.f32.xlu1 %v1896_v56  ;;  %p2602_p4 = pnand %p2601_p3, %p2595_p0 }
0x13d6   :  { %1900 = vadd.xlane.f32.xlu0 %v1899_v58 }
0x145d   :  { %v1888_v59 = vpop.xlane.xlu1 %1887 }
0x145e   :  { %v1892_v61 = vmul.f32 0.03125, %v1888_v59 }
0x145f   :  { %v1891_v0 = vpop.xlane.xlu0 %1890 }
0x1460   :  { %v1893_v3 = vmul.f32 0.03125, %v1891_v0  ;;  %v1904_v39 = vmul.f32 %v1892_v61, %v1892_v61  ;;  %v1910_v19 = vsub.f32 %v1884_v45, %v1892_v61  ;;  %v2178_v61 = vsel %vm2019_vm9, 1.0, %v2631_v2 }
0x1461   :  { %v1898_v49 = vpop.xlane.xlu1 %1897  ;;  %v2179_v0 = vsel %vm2020_vm10, 1.0, %v2631_v2 }
0x1462   :  { %v1902_v51 = vmul.f32 0.03125, %v1898_v49  ;;  %v1905_v6 = vmul.f32 %v1893_v3, %v1893_v3  ;;  %v1911_v23 = vsub.f32 %v1885_v50, %v1893_v3  ;;  %v2062_v3 = vsel %vm2049_vm13, %v2178_v61, 0.0 }
0x1463   :  { %v1901_v5 = vpop.xlane.xlu0 %1900  ;;  %v2063_v49 = vsel %vm2049_vm13, %v2179_v0, 0.0 }
0x1464   :  { %v1906_v7 = vsub.f32 %v1902_v51, %v1904_v39  ;;  %v1903_v4 = vmul.f32 0.03125, %v1901_v5  ;;  %v2064_v39 = vadd.f32 %v2063_v49, %v2062_v3 }
0x1466   :  { %v1908_v16 = vmax.f32 %v1906_v7, 0.0  ;;  %v1907_v9 = vsub.f32 %v1903_v4, %v1905_v6 }
0x1468   :  { %v1912_v15 = vadd.f32 1e-12, %v1908_v16  ;;  %v1909_v60 = vmax.f32 %v1907_v9, 0.0 }
0x146a   :  { %2579 = vrsqrt.f32 %v1912_v15  ;;  %v1913_v11 = vadd.f32 1e-12, %v1909_v60 }
0x146c   :  { %2581 = vrsqrt.f32 %v1913_v11 }
0x1474   :  { %v2580_v22 = vpop.eup %2579 }
0x1475   :  { %v1916_v31 = vmul.f32 %v2580_v22, %v1910_v19 }
0x1476   :  { %v2582_v24 = vpop.eup %2581 }
0x1477   :  { %v1917_v25 = vmul.f32 %v2582_v24, %v1911_v23  ;;  %v1922_v26 = vmul.f32 %v1921_v30, %v1916_v31 }
0x1479   :  { %v1923_v28 = vmul.f32 %v1921_v30, %v1917_v25  ;;  %v1928_v29 = vadd.f32 %v1927_v27, %v1922_v26 }
0x147b   :  { %v1929_v32 = vadd.f32 %v1927_v27, %v1923_v28 }
0x147d   :  { %v1930_v33 = vpack.c.bf16 %v1929_v32, %v1928_v29 }
0x147f   :  { %2447 = vmatmul.mubr.msk.bf16.vlgmr.msra.gmra.mrb[52].mxu1 %vm166_vm4, %v1930_v33 }
0x1552   :  { %v1988_v35 = vpop.f32.mrb[52].mxu1 }
0x1553   :  { %v1989_v36 = vadd.f32 %v1988_v35, %v1938_v34  ;;  %v2448_v12 = vpop.f32.mrb[53].mxu1 }
0x1554   :  { %v1991_v55 = vpop.f32.mrb[54].mxu1 }
0x1555   :  { %1995 = vst [vmem:[#allocation2] sm:$0xff] %v1989_v36  ;;  %v1992_v48 = vadd.f32 %v1991_v55, %v1938_v34  ;;  %1997 = vmax.xlane.f32.xlu1 %v1989_v36  ;;  %v2449_v42 = vpop.f32.mrb[55].mxu1 }
0x1557   :  { %1996 = vst [vmem:[#allocation2 + $0x8] sm:$0xff] %v1992_v48  ;;  %1999 = vmax.xlane.f32.xlu0 %v1992_v48 }
0x15e2   :  { %v1998_v18 = vpop.xlane.xlu1 %1997 }
0x15e3   :  { %v2001_v37 = vsub.f32 %v1989_v36, %v1998_v18 }
0x15e4   :  { %v2000_v54 = vpop.xlane.xlu0 %1999 }
0x15e5   :  { %v2003_v17 = vmul.f32 1.442695, %v2001_v37  ;;  %v2002_v20 = vsub.f32 %v1992_v48, %v2000_v54 }
0x15e7   :  { %2583 = vpow2.f32 %v2003_v17  ;;  %v2005_v21 = vmul.f32 1.442695, %v2002_v20 }
0x15e9   :  { %2585 = vpow2.f32 %v2005_v21 }
0x15f1   :  { %v2584_v10 = vpop.eup %2583 }
0x15f2   :  { %2007 = vadd.xlane.f32.xlu1 %v2584_v10 }
0x15f3   :  { %v2586_v8 = vpop.eup %2585 }
0x15f4   :  { %2009 = vadd.xlane.f32.xlu0 %v2586_v8 }
0x1603   :  { %2028 = vperm.xlu1 %2492, %v2025_v40  }
0x160a   :  { %2031 = vperm.xlu0 %2471, %v2026_v43  }
0x167f   :  { %v2008_v44 = vpop.xlane.xlu1 %2007 }
0x1680   :  { %2587 = vlog2.f32 %v2008_v44 }
0x1681   :  { %v2010_v45 = vpop.xlane.xlu0 %2009 }
0x1682   :  { %2589 = vlog2.f32 %v2010_v45 }
0x1683   :  { %v2029_v46 = vpop.permute.xlu1 %2028 }
0x1684   :  { %vm2033_vm11 = vcmp.eq.s32.totalorder %v2029_v46, %v2749_v14 }
0x1685   :  { %v2180_v62 = vsel %vm2033_vm11, 1.0, %v2631_v2 }
0x1689   :  { %v2032_v50 = vpop.permute.xlu0 %2031 }
0x168a   :  { %v2588_v47 = vpop.eup %2587  ;;  %vm2034_vm12 = vcmp.eq.s32.totalorder %v2032_v50, %v2749_v14 }
0x168b   :  { %v2012_v52 = vmul.f32 0.6931472, %v2588_v47  ;;  %v2181_v63 = vsel %vm2034_vm12, 1.0, %v2631_v2 }
0x168c   :  { %v2590_v53 = vpop.eup %2589 }
0x168d   :  { %v2014_v1 = vmul.f32 0.6931472, %v2590_v53  ;;  %v2015_v56 = vsub.f32 %v2001_v37, %v2012_v52 }
0x168f   :  { %v2039_v58 = vmul.f32 %v2180_v62, %v2015_v56  ;;  %v2016_v57 = vsub.f32 %v2002_v20, %v2014_v1 }
0x1691   :  { %2041 = vadd.xlane.f32.xlu1 %v2039_v58  ;;  %v2040_v59 = vmul.f32 %v2181_v63, %v2016_v57 }
0x1693   :  { %2043 = vadd.xlane.f32.xlu0 %v2040_v59 }
0x1697   :  { %2065 = vadd.xlane.f32.xlu0 %v2064_v39 }
0x171e   :  { %v2042_v14 = vpop.xlane.xlu1 %2041 }
0x171f   :  { %v2045_v51 = vsub.f32 0.0, %v2042_v14 }
0x1720   :  { %v2044_v5 = vpop.xlane.xlu0 %2043 }
0x1721   :  { %v2047_v6 = vmul.f32 %v2178_v61, %v2045_v51  ;;  %v2046_v7 = vsub.f32 0.0, %v2044_v5 }
0x1723   :  { %v2048_v4 = vmul.f32 %v2179_v0, %v2046_v7  ;;  %v2050_v16 = vsel %vm2049_vm13, %v2047_v6, 0.0 }
0x1724   :  { %v2066_v60 = vpop.xlane.xlu0 %2065 }
0x1725   :  { %v2051_v9 = vsel %vm2049_vm13, %v2048_v4, 0.0  ;;  %v2067_v11 = vrot.slane %v2066_v60, 4 }
0x1726   :  { %v2052_v15 = vadd.f32 %v2051_v9, %v2050_v16 }
0x1727   :  { %v2068_v19 = vadd.f32 %v2067_v11, %v2066_v60 }
0x1728   :  { %2053 = vadd.xlane.f32.xlu1 %v2052_v15 }
0x1729   :  { %v2069_v30 = vrot.slane %v2068_v19, 2 }
0x17b5   :  { %v2054_v2 = vpop.xlane.xlu1 %2053 }
0x17b6   :  { %v2055_v22 = vrot.slane %v2054_v2, 4 }
0x17b8   :  { %v2056_v23 = vadd.f32 %v2055_v22, %v2054_v2 }
0x17b9   :  { %2605 = shalt.err (!%p2602_p4)
}
0x17ba   :  { %s2606_s0 = scalar_lea.hbm %s3216_s10, 256 }
0x17bb   :  { %p2607_p5 = scmp.ne.s32.totalorder %s3216_s10, %s2606_s0  ;;  %p2610_p6 = scmp.lt.u32.totalorder %s2606_s0, %s3216_s10 }
0x17bd   :  { %p2612_p7 = pnand %p2610_p6, %p2607_p5 }
0x17bf   :  { %2615 = shalt.err (!%p2612_p7)
}
0x17c0   :  { %s2641_s2 = smov 128   ;;  %s2642_s7 = smov 8   ;;  %v2070_v31 = vadd.f32 %v2069_v30, %v2068_v19  ;;  %v2057_v24 = vrot.slane %v2056_v23, 2 }
0x17c1   :  { %2092 = dma.vmem_to_hbm [thread:$0]  %s2087_s21, 256, %s3216_s10, [#allocation3], %s2641_s2, %s2641_s2, %s2642_s7  }
0x17c2   :  { %v2058_v25 = vadd.f32 %v2057_v24, %v2056_v23  ;;  %v2071_v26 = vrot.slane %v2070_v31, 1  ;;  %s2643_s13 = smov 1.0   ;;  %s2616_s3 = scalar_lea.hbm %s3217_s11, 16 }
0x17c3   :  { %p2617_p8 = scmp.ne.s32.totalorder %s3217_s11, %s2616_s3  ;;  %p2620_p9 = scmp.lt.u32.totalorder %s2616_s3, %s3217_s11 }
0x17c4   :  { %v2059_v27 = vrot.slane %v2058_v25, 1  ;;  %v2072_v29 = vadd.f32 %v2071_v26, %v2070_v31 }
0x17c5   :  { %p2622_p10 = pnand %p2620_p9, %p2617_p8 }
0x17c6   :  { %v2060_v28 = vadd.f32 %v2059_v27, %v2058_v25 }
0x17c8   :  { %2450 = vpush %v2060_v28 }
0x17c9   :  { %2452 = vpush %v2072_v29 }
0x17f9   :  { %s2451_s30 = spop %2450 }
0x17fa   :  { %s2453_s12 = spop %2452 }
0x17fb   :  { %s2074_s14 = smax.f32 %s2643_s13, %s2453_s12 }
0x17fc   :  { %v2075_v32 = vstv %s2074_s14 }
0x17fd   :  { %2591 = vrcp.f32 %v2075_v32 }
0x1807   :  { %v2592_v33 = vpop.eup %2591 }
0x1808   :  { %2454 = vpush %v2592_v33 }
0x1839   :  { %s2455_s15 = spop %2454 }
0x183a   :  { %s2078_s8 = smul.f32 %s2455_s15, %s2451_s30 }
0x183c   :  { %2080 = sst [smem:[#allocation5]] %s2078_s8 }
0x183d   :  { %2625 = shalt.err (!%p2622_p10)
}
0x183e   :  { %s2644_s18 = smov [#allocation5]  }
0x183f   :  { %2100 = dma.smem_to_hbm %s2644_s18, 16, %s3217_s11, [#allocation4]  }
0x1840   :  { %2626 = dma.done.wait [#allocation3], 256  }
0x1841   :  { %2627 = vsyncadd [#allocation3], 4294967040 }
0x1842   :  { %2628 = dma.done.wait [#allocation4], 16  }
0x1843   :  { %2629 = vsyncadd [#allocation4], 4294967280 }
0x1844   :  { %2107 = sfence }
0x1845   :  { %2108 = vsyncpa [#allocation3], 1 }
0x1846   :  { %2109 = vsyncpa [#allocation4], 1 }

</bundles_post_ra>
